<compile_context>
chip_gen: v5e
topology: v5e:2x2
jax: 0.10.0
libtpu: 0.0.40
codegen_flags: <defaults>
</compile_context>

<pallas_src>
import functools

import jax
import jax.numpy as jnp
from jax.experimental import pallas as pl
from jax.experimental.pallas import tpu as pltpu


def _transition_kernel(x_ref, wt_ref, scale_ref, bias_ref, o_ref, y_scr, *, Nb, Ht, W):
    # x_ref:     (Nb, Cin, Ht*W)        bf16, NCHW slab of Ht image rows
    # wt_ref:    (Cin, Cout)            bf16 pre-transposed 1x1-conv weight
    # scale_ref: (1, Cout)              f32  = 0.25 * gamma / sqrt(var + eps)
    # bias_ref:  (1, Cout)              f32  = beta - mean * gamma / sqrt(var + eps)
    # o_ref:     (Nb, Cout, (Ht/2)*(W/2))  bf16, NCHW-flattened pooled output
    # y_scr:     (Ht*W, Cout)           f32 VMEM scratch (post-ReLU activations)
    Wo = W // 2
    Hot = Ht // 2

    wt = wt_ref[...]
    scale = scale_ref[...]
    bias = bias_ref[...]

    # Unrolled loop over the Nb images in this block (amortizes grid-step cost).
    for i in range(Nb):
        x = x_ref[i]                                               # (Cin, Ht*W)
        # 1x1 conv on the MXU, contracting Cin of both operands so the result
        # comes out channels-minor (Ht*W, Cout) with NO standalone activation
        # transpose.  bf16 inputs, f32 accumulation.
        y = jax.lax.dot_general(x, wt, (((0,), (0,)), ((), ())),
                                preferred_element_type=jnp.float32)  # (Ht*W, Cout)
        y_scr[...] = jnp.maximum(y, 0.0)                           # ReLU (f32, VPU)

        # ---- AvgPool2d(2,2) as strided sublane adds (no pool matrix) ----
        # Rows of y_scr are (h, w) row-major; adjacent-w pairs are even/odd rows.
        wsum = (y_scr[pl.ds(0, Ht * Wo, stride=2), :] +
                y_scr[pl.ds(1, Ht * Wo, stride=2), :])             # (Ht*Wo, Cout)
        # Adjacent-h pairs: rows of wsum come in groups of 2*Wo = [h even | h odd].
        # TODO(synk): if 2*Wo is not a multiple of 8 (e.g. W=14), this reshape may
        #             materialize a VMEM relayout copy; pad W or restructure then.
        w3 = wsum.reshape(Hot, 2 * Wo, -1)
        hsum = (w3[:, :Wo, :] + w3[:, Wo:, :]).reshape(Hot * Wo, -1)  # (Hot*Wo, Cout)

        # BatchNorm (eval) fused with the 1/4 pool factor, applied post-pool.
        out = hsum * scale + bias                                  # (Hot*Wo, Cout) f32

        # Cast to the (bf16) output dtype BEFORE the small transpose, then store
        # channels-major (NCHW).  Dropout(0.25) is identity in eval mode.
        o_ref[i] = out.astype(o_ref.dtype).T                       # (Cout, Hot*Wo)


def transition_layer(x_nchw, conv_w, bn_gamma, bn_beta, bn_mean, bn_var, *,
                     eps=1e-5, row_tile=None, batch_tile=1,
                     compute_dtype=jnp.bfloat16, out_dtype=jnp.bfloat16):
    N, Cin, H, W = x_nchw.shape
    Cout = conv_w.shape[0]
    # TODO(synk): odd H/W (PyTorch AvgPool2d(2,2) drops the trailing row/col).
    assert H % 2 == 0 and W % 2 == 0, "H and W must be even"
    Ho, Wo = H // 2, W // 2

    Ht = H if row_tile is None else row_tile                       # spatial row tile
    Nb = batch_tile                                                # images per grid step
    assert H % Ht == 0 and Ht % 2 == 0, "row_tile must be even and divide H"
    assert N % Nb == 0, "batch_tile must divide N"
    Hot = Ht // 2
    # Tiled spatial blocks must keep the flattened spatial dims 128-aligned
    # (lane-dense, unmasked stores); full-extent blocks are always legal.
    assert Ht == H or ((Ht * W) % 128 == 0 and (Hot * Wo) % 128 == 0), (
        "row_tile must keep Ht*W and (Ht/2)*(W/2) multiples of 128")

    # Free reshape (no transpose); bf16 halves HBM reads and doubles MXU rate.
    x = x_nchw.reshape(N, Cin, H * W).astype(compute_dtype)
    wt = conv_w.reshape(Cout, Cin).T.astype(compute_dtype)         # (Cin, Cout), tiny
    s = bn_gamma / jnp.sqrt(bn_var + eps)
    scale = (0.25 * s).reshape(1, Cout).astype(jnp.float32)        # BN scale ⊙ 1/4 pool
    bias = (bn_beta - bn_mean * s).reshape(1, Cout).astype(jnp.float32)

    kernel = functools.partial(_transition_kernel, Nb=Nb, Ht=Ht, W=W)

    # VMEM budget: double-buffered input/output blocks + weight + scale/bias
    # + f32 scratch.  Explicit limit so block sizes can be grown on v5e/v6e
    # (128 MiB) while staying honest about v7x's 64 MiB.
    out_bytes = jnp.dtype(out_dtype).itemsize
    vmem_est = (2 * Nb * Cin * Ht * W * 2          # input blocks (bf16, double-buffered)
                + 2 * Nb * Cout * Hot * Wo * out_bytes  # output blocks (double-buffered)
                + 2 * Cin * Cout * 2               # weight (double-buffered, tiny)
                + 4 * Cout * 4                     # scale + bias
                + Ht * W * Cout * 4)               # f32 activation scratch
    vmem_limit = min(max(vmem_est * 3 // 2 + (1 << 20), 32 << 20), 100 << 20)

    out = pl.pallas_call(
        kernel,
        out_shape=jax.ShapeDtypeStruct((N, Cout, Ho * Wo), out_dtype),
        grid_spec=pltpu.PrefetchScalarGridSpec(
            num_scalar_prefetch=0,
            grid=(N // Nb, H // Ht),
            in_specs=[
                pl.BlockSpec((Nb, Cin, Ht * W), lambda n, h: (n, 0, h)),
                pl.BlockSpec((Cin, Cout), lambda n, h: (0, 0)),
                pl.BlockSpec((1, Cout), lambda n, h: (0, 0)),
                pl.BlockSpec((1, Cout), lambda n, h: (0, 0)),
            ],
            out_specs=pl.BlockSpec((Nb, Cout, Hot * Wo), lambda n, h: (n, 0, h)),
            scratch_shapes=[pltpu.VMEM((Ht * W, Cout), jnp.float32)],
        ),
        compiler_params=pltpu.CompilerParams(
            dimension_semantics=("parallel", "parallel"),
            vmem_limit_bytes=int(vmem_limit)),
    )(x, wt, scale, bias)

    return out.reshape(N, Cout, Ho, Wo)                            # NCHW pooled


def reference_jax(x_nchw, conv_w, bn_gamma, bn_beta, bn_mean, bn_var,
                  *, eps=1e-5, compute_dtype=jnp.bfloat16):
    """Pure-JAX eval-mode reference with the same bf16 rounding of matmul inputs."""
    N, Cin, H, W = x_nchw.shape
    Cout = conv_w.shape[0]
    xq = x_nchw.astype(compute_dtype).astype(jnp.float32)
    wq = conv_w.reshape(Cout, Cin).astype(compute_dtype).astype(jnp.float32)
    y = jnp.einsum("nchw,dc->ndhw", xq, wq)                        # 1x1 conv
    y = jnp.maximum(y, 0.0)                                        # ReLU
    s = bn_gamma / jnp.sqrt(bn_var + eps)
    y = y * s[None, :, None, None] + (bn_beta - bn_mean * s)[None, :, None, None]
    y = y.reshape(N, Cout, H // 2, 2, W // 2, 2).mean(axis=(3, 5))  # AvgPool2d(2,2)
    return y                                                       # Dropout = identity (eval)


if __name__ == "__main__":
    # DenseNet-style transition: channels halved, spatial halved.
    N, Cin, Cout, H, W = 2, 16, 8, 32, 32

    key = jax.random.PRNGKey(0)
    kx, kw, kg, kb, km, kv = jax.random.split(key, 6)
    x = jax.random.normal(kx, (N, Cin, H, W), jnp.float32)
    conv_w = jax.random.normal(kw, (Cout, Cin, 1, 1), jnp.float32) * 0.1
    bn_gamma = 1.0 + 0.1 * jax.random.normal(kg, (Cout,), jnp.float32)
    bn_beta = 0.1 * jax.random.normal(kb, (Cout,), jnp.float32)
    bn_mean = 0.05 * jax.random.normal(km, (Cout,), jnp.float32)
    bn_var = 1.0 + 0.1 * jax.random.uniform(kv, (Cout,), jnp.float32)

    # batch_tile=2, row_tile=16 -> grid (1, 2): exercises both the per-step
    # image batching (unrolled inner loop) and the spatial tiling path, while
    # keeping >= 2 parallel grid steps for megacore / v7x's 2 TensorCores.
    out = transition_layer(x, conv_w, bn_gamma, bn_beta, bn_mean, bn_var,
                           row_tile=16, batch_tile=2)
    out = jax.block_until_ready(out)

    ref = reference_jax(x, conv_w, bn_gamma, bn_beta, bn_mean, bn_var)
    assert out.shape == (N, Cout, H // 2, W // 2), out.shape
    out_f32 = out.astype(jnp.float32)
    max_err = float(jnp.max(jnp.abs(out_f32 - ref)))
    # Output is stored in bf16 (per perf review) -> bf16-level tolerance.
    assert jnp.allclose(out_f32, ref, atol=2e-2, rtol=2e-2), max_err

    print("KERNEL_OK")
</pallas_src>

<mosaic_0001>
module attributes {stable_mosaic.version = 11 : i64} {
  func.func @_transition_kernel(%arg0: i32, %arg1: i32, %arg2: memref<2x16x512xbf16, #tpu.memory_space<vmem>>, %arg3: memref<16x8xbf16, #tpu.memory_space<vmem>>, %arg4: memref<1x8xf32, #tpu.memory_space<vmem>>, %arg5: memref<1x8xf32, #tpu.memory_space<vmem>>, %arg6: memref<2x8x128xbf16, #tpu.memory_space<vmem>>, %arg7: memref<512x8xf32, #tpu.memory_space<vmem>>) attributes {dimension_semantics = [#tpu.dimension_semantics<parallel>, #tpu.dimension_semantics<parallel>], iteration_bounds = array<i64: 1, 2>, scalar_prefetch = 0 : i64, scratch_operands = 1 : i64, tpu.core_type = #tpu.core_type<tc>, window_params = [{transform_indices = @transform_0, window_bounds = array<i64: 2, 16, 512>}, {pipeline_mode = #tpu.pipeline_mode<synchronous>, transform_indices = @transform_1, window_bounds = array<i64: 16, 8>}, {pipeline_mode = #tpu.pipeline_mode<synchronous>, transform_indices = @transform_2, window_bounds = array<i64: 1, 8>}, {pipeline_mode = #tpu.pipeline_mode<synchronous>, transform_indices = @transform_3, window_bounds = array<i64: 1, 8>}, {transform_indices = @transform_4, window_bounds = array<i64: 2, 8, 128>}]} {
    %c0 = arith.constant 0 : index
    %c0_0 = arith.constant 0 : index
    %0 = vector.load %arg3[%c0, %c0_0] : memref<16x8xbf16, #tpu.memory_space<vmem>>, vector<16x8xbf16>
    %c0_1 = arith.constant 0 : index
    %c0_2 = arith.constant 0 : index
    %1 = vector.load %arg4[%c0_1, %c0_2] : memref<1x8xf32, #tpu.memory_space<vmem>>, vector<1x8xf32>
    %c0_3 = arith.constant 0 : index
    %c0_4 = arith.constant 0 : index
    %2 = vector.load %arg5[%c0_3, %c0_4] : memref<1x8xf32, #tpu.memory_space<vmem>>, vector<1x8xf32>
    %c0_5 = arith.constant 0 : index
    %c0_6 = arith.constant 0 : index
    %c0_7 = arith.constant 0 : index
    %3 = vector.load %arg2[%c0_5, %c0_6, %c0_7] : memref<2x16x512xbf16, #tpu.memory_space<vmem>>, vector<1x16x512xbf16>
    %4 = vector.shape_cast %3 : vector<1x16x512xbf16> to vector<16x512xbf16>
    %cst = arith.constant dense<0.000000e+00> : vector<512x8xf32>
    %5 = tpu.matmul %4, %0, %cst {dimension_numbers = #tpu.dot_dimension_numbers<[0], [0], [1], [1], [0, 1, 1, 1], [], []>} : vector<16x512xbf16>, vector<16x8xbf16>, vector<512x8xf32> -> vector<512x8xf32>
    %cst_8 = arith.constant 0.000000e+00 : f32
    %6 = vector.broadcast %cst_8 : f32 to vector<512x8xf32>
    %7 = arith.maximumf %5, %6 : vector<512x8xf32>
    %c0_9 = arith.constant 0 : index
    %c0_10 = arith.constant 0 : index
    %8 = vector.load %arg7[%c0_9, %c0_10] : memref<512x8xf32, #tpu.memory_space<vmem>>, vector<512x8xf32>
    tpu.vector_store %arg7[%c0_9, %c0_10], %7 {strides = array<i32>} : memref<512x8xf32, #tpu.memory_space<vmem>>, vector<512x8xf32>,
    %c0_11 = arith.constant 0 : index
    %c0_12 = arith.constant 0 : index
    %9 = tpu.strided_load %arg7[%c0_11, %c0_12] {strides = array<i32: 2, 1>} : memref<512x8xf32, #tpu.memory_space<vmem>>, vector<256x8xf32>
    %c1 = arith.constant 1 : index
    %c0_13 = arith.constant 0 : index
    %10 = tpu.strided_load %arg7[%c1, %c0_13] {strides = array<i32: 2, 1>} : memref<512x8xf32, #tpu.memory_space<vmem>>, vector<256x8xf32>
    %11 = arith.addf %9, %10 : vector<256x8xf32>
    %12 = vector.shape_cast %11 : vector<256x8xf32> to vector<8x32x8xf32>
    %13 = vector.extract_strided_slice %12 {offsets = [0, 0, 0], sizes = [8, 16, 8], strides = [1, 1, 1]} : vector<8x32x8xf32> to vector<8x16x8xf32>
    %14 = vector.extract_strided_slice %12 {offsets = [0, 16, 0], sizes = [8, 16, 8], strides = [1, 1, 1]} : vector<8x32x8xf32> to vector<8x16x8xf32>
    %15 = arith.addf %13, %14 : vector<8x16x8xf32>
    %16 = vector.shape_cast %15 : vector<8x16x8xf32> to vector<128x8xf32>
    %17 = vector.broadcast %1 : vector<1x8xf32> to vector<128x8xf32>
    %18 = arith.mulf %16, %17 : vector<128x8xf32>
    %19 = vector.broadcast %2 : vector<1x8xf32> to vector<128x8xf32>
    %20 = arith.addf %18, %19 : vector<128x8xf32>
    %21 = arith.truncf %20 : vector<128x8xf32> to vector<128x8xbf16>
    %22 = tpu.transpose %21, [1, 0] : vector<128x8xbf16> -> vector<8x128xbf16>
    %c0_14 = arith.constant 0 : index
    %c0_15 = arith.constant 0 : index
    %c0_16 = arith.constant 0 : index
    %23 = vector.load %arg6[%c0_14, %c0_15, %c0_16] : memref<2x8x128xbf16, #tpu.memory_space<vmem>>, vector<1x8x128xbf16>
    %24 = vector.shape_cast %23 : vector<1x8x128xbf16> to vector<8x128xbf16>
    %25 = vector.shape_cast %22 : vector<8x128xbf16> to vector<1x8x128xbf16>
    tpu.vector_store %arg6[%c0_14, %c0_15, %c0_16], %25 {strides = array<i32>} : memref<2x8x128xbf16, #tpu.memory_space<vmem>>, vector<1x8x128xbf16>,
    %c1_17 = arith.constant 1 : index
    %c0_18 = arith.constant 0 : index
    %c0_19 = arith.constant 0 : index
    %26 = vector.load %arg2[%c1_17, %c0_18, %c0_19] : memref<2x16x512xbf16, #tpu.memory_space<vmem>>, vector<1x16x512xbf16>
    %27 = vector.shape_cast %26 : vector<1x16x512xbf16> to vector<16x512xbf16>
    %cst_20 = arith.constant dense<0.000000e+00> : vector<512x8xf32>
    %28 = tpu.matmul %27, %0, %cst_20 {dimension_numbers = #tpu.dot_dimension_numbers<[0], [0], [1], [1], [0, 1, 1, 1], [], []>} : vector<16x512xbf16>, vector<16x8xbf16>, vector<512x8xf32> -> vector<512x8xf32>
    %cst_21 = arith.constant 0.000000e+00 : f32
    %29 = vector.broadcast %cst_21 : f32 to vector<512x8xf32>
    %30 = arith.maximumf %28, %29 : vector<512x8xf32>
    %c0_22 = arith.constant 0 : index
    %c0_23 = arith.constant 0 : index
    %31 = vector.load %arg7[%c0_22, %c0_23] : memref<512x8xf32, #tpu.memory_space<vmem>>, vector<512x8xf32>
    tpu.vector_store %arg7[%c0_22, %c0_23], %30 {strides = array<i32>} : memref<512x8xf32, #tpu.memory_space<vmem>>, vector<512x8xf32>,
    %c0_24 = arith.constant 0 : index
    %c0_25 = arith.constant 0 : index
    %32 = tpu.strided_load %arg7[%c0_24, %c0_25] {strides = array<i32: 2, 1>} : memref<512x8xf32, #tpu.memory_space<vmem>>, vector<256x8xf32>
    %c1_26 = arith.constant 1 : index
    %c0_27 = arith.constant 0 : index
    %33 = tpu.strided_load %arg7[%c1_26, %c0_27] {strides = array<i32: 2, 1>} : memref<512x8xf32, #tpu.memory_space<vmem>>, vector<256x8xf32>
    %34 = arith.addf %32, %33 : vector<256x8xf32>
    %35 = vector.shape_cast %34 : vector<256x8xf32> to vector<8x32x8xf32>
    %36 = vector.extract_strided_slice %35 {offsets = [0, 0, 0], sizes = [8, 16, 8], strides = [1, 1, 1]} : vector<8x32x8xf32> to vector<8x16x8xf32>
    %37 = vector.extract_strided_slice %35 {offsets = [0, 16, 0], sizes = [8, 16, 8], strides = [1, 1, 1]} : vector<8x32x8xf32> to vector<8x16x8xf32>
    %38 = arith.addf %36, %37 : vector<8x16x8xf32>
    %39 = vector.shape_cast %38 : vector<8x16x8xf32> to vector<128x8xf32>
    %40 = vector.broadcast %1 : vector<1x8xf32> to vector<128x8xf32>
    %41 = arith.mulf %39, %40 : vector<128x8xf32>
    %42 = vector.broadcast %2 : vector<1x8xf32> to vector<128x8xf32>
    %43 = arith.addf %41, %42 : vector<128x8xf32>
    %44 = arith.truncf %43 : vector<128x8xf32> to vector<128x8xbf16>
    %45 = tpu.transpose %44, [1, 0] : vector<128x8xbf16> -> vector<8x128xbf16>
    %c1_28 = arith.constant 1 : index
    %c0_29 = arith.constant 0 : index
    %c0_30 = arith.constant 0 : index
    %46 = vector.load %arg6[%c1_28, %c0_29, %c0_30] : memref<2x8x128xbf16, #tpu.memory_space<vmem>>, vector<1x8x128xbf16>
    %47 = vector.shape_cast %46 : vector<1x8x128xbf16> to vector<8x128xbf16>
    %48 = vector.shape_cast %45 : vector<8x128xbf16> to vector<1x8x128xbf16>
    tpu.vector_store %arg6[%c1_28, %c0_29, %c0_30], %48 {strides = array<i32>} : memref<2x8x128xbf16, #tpu.memory_space<vmem>>, vector<1x8x128xbf16>,
    return
  }
  func.func @transform_0(%arg0: i32, %arg1: i32) -> (i32, i32, i32) {
    %c0_i32 = arith.constant 0 : i32
    %c0_i32_0 = arith.constant 0 : i32
    return %arg0, %c0_i32, %arg1 : i32, i32, i32
  }
  func.func @transform_1(%arg0: i32, %arg1: i32) -> (i32, i32) {
    %c0_i32 = arith.constant 0 : i32
    %c0_i32_0 = arith.constant 0 : i32
    %c0_i32_1 = arith.constant 0 : i32
    return %c0_i32, %c0_i32_0 : i32, i32
  }
  func.func @transform_2(%arg0: i32, %arg1: i32) -> (i32, i32) {
    %c0_i32 = arith.constant 0 : i32
    %c0_i32_0 = arith.constant 0 : i32
    %c0_i32_1 = arith.constant 0 : i32
    return %c0_i32, %c0_i32_0 : i32, i32
  }
  func.func @transform_3(%arg0: i32, %arg1: i32) -> (i32, i32) {
    %c0_i32 = arith.constant 0 : i32
    %c0_i32_0 = arith.constant 0 : i32
    %c0_i32_1 = arith.constant 0 : i32
    return %c0_i32, %c0_i32_0 : i32, i32
  }
  func.func @transform_4(%arg0: i32, %arg1: i32) -> (i32, i32, i32) {
    %c0_i32 = arith.constant 0 : i32
    %c0_i32_0 = arith.constant 0 : i32
    return %arg0, %c0_i32, %arg1 : i32, i32, i32
  }
}

</mosaic_0001>

<bundles_post_ra>
// kernel: tpu_custom_call.1
= control target key start
LH: loop header
LB: loop body
LE: loop exit
PB: predicated region body
PF: predicated region fallthrough
CT: control target
= control target key end

     0   :  { %9 = vsyncpa [#allocation4], 0  ;;  %s2647_s0 = inlined_call_operand.hbm [shape: bf16[2,16,1024], index: 0, kind: input, shape index: {}]   ;;  %s2648_s1 = inlined_call_operand.vmem [shape: bf16[16,8], index: 1, kind: input, shape index: {}]   ;;  %s2649_s2 = inlined_call_operand.vmem [shape: f32[1,8], index: 2, kind: input, shape index: {}]   ;;  %s2650_s3 = inlined_call_operand.vmem [shape: f32[1,8], index: 3, kind: input, shape index: {}]   ;;  %s2651_s4 = inlined_call_operand.hbm [shape: bf16[2,8,256], index: 4, kind: output, shape index: {}]  }
   0x1   :  { %11 = vsyncpa [#allocation4 + $0x1], 0 }
   0x2   :  { %12 = vsyncpa [#allocation5], 0 }
   0x3   :  { %14 = vsyncpa [#allocation5 + $0x1], 0  ;;  %s2053_s15 = smov 0   ;;  %s2055_s16 = smov 0  }
   0x4   :  { %s2057_s17 = smov 0   ;;  %s2059_s18 = smov 0  }
   0x5   :  { %s2061_s19 = smov 0   ;;  %s2063_s20 = smov 0  }
   0x6 LB: > { %s1696_s21 = sadd.s32 4294967295, %s2020_s20   ;;  %s1697_s22 = sadd.s32 4294967294, %s2020_s20   ;;  %s2020_s20 = sphi %s2063_s20, %s20_s20   ;;  %s2016_s19 = sphi %s2061_s19, %s2660_s19   ;;  %s2012_s18 = sphi %s2059_s18, %s2659_s18   ;;  %s2008_s17 = sphi %s2057_s17, %s2658_s17   ;;  %s2004_s16 = sphi %s2055_s16, %s2657_s16   ;;  %s2000_s15 = sphi %s2053_s15, %s2656_s15  }
   0x7   : > { %s29_s23 = sadd.s32 1, %s2016_s19  ;;  %s41_s24 = sadd.s32 1, %s2008_s17 }
   0x8   : > { %p30_p0 = scmp.ge.s32.totalorder %s29_s23, 2  ;;  %p48_p1 = scmp.ne.s32.totalorder %s2008_s17, %s2004_s16 }
   0x9   : > { %p49_p2 = scmp.eq.s32.totalorder %s2020_s20, 0  ;;  %p54_p3 = scmp.ne.s32.totalorder %s2004_s16, %s2000_s15 }
   0xa   : > { %s2662_s23 = smov (%p30_p0, %s29_s23), 0  ;;  %p55_p5 = scmp.eq.s32.totalorder %s1696_s21, 0 }
   0xb   : > { %p2094_p4 = por %p49_p2, %p48_p1  ;;  %s37_s26 = ssub.s32 %s2016_s19, %s2662_s23 }
   0xc   : > { %p143_p6 = scmp.eq.s32.totalorder %s1696_s21, 1  ;;  %p39_p7 = scmp.eq.s32.totalorder %s37_s26, 0 }
   0xd   : > { %p2100_p8 = por %p55_p5, %p54_p3  ;;  %p149_p10 = scmp.eq.s32.totalorder %s1697_s22, 1 }
   0xe   : > { %p2104_p9 = por %p143_p6, %p48_p1  ;;  %p1699_p12 = scmp.ge.s32.totalorder %s2020_s20, 2 }
   0xf   : > { %s2109_s29 = scalar_select %p39_p7, %s2008_s17, %s41_s24  }
  0x10   : > { %p2111_p11 = por %p149_p10, %p54_p3  ;;  %p1839_p13 = scmp.lt.s32.totalorder %s2020_s20, 2 }
  0x11   : > { %s178_s5 = sand.u32 1, %s2008_s17   ;;  %s1815_s7 = sshll.u32 %s2016_s19, 4 }
  0x12   : > { %s1700_s6 = sshll.u32 %s178_s5, 6  ;;  %s190_s10 = scalar_lea.hbm %s2647_s0, %s1815_s7 }
  0x13   : > { %s182_s11 = scalar_lea.vmem [#allocation3], %s1700_s6  ;;  %s191_s13 = sshll.u32 %s190_s10, 4  ;;  %s192_s13 = int_to_ptr.hbm [resolvable:$true] %s191_s13 }
  0x14   : > { %s193_s12 = sshll.u32 %s182_s11, 4  ;;  %p1832_p0 = pnand %p1839_p13, %p2094_p4  ;;  %s194_s12 = int_to_ptr.vmem [resolvable:$true] %s193_s12 }
  0x15   : > { %s179_s14 = scalar_lea.sflag [#allocation4], %s178_s5  ;;  %s2022_s21 = smov 512  }
  0x16   : > { %s2023_s22 = smov 256   ;;  %s2024_s24 = smov 16  }
  0x17   : > { %1834 = dma.hbm_to_vmem [thread:$0]  (!%p1832_p0), %s192_s13, 1024, %s194_s12, %s179_s14, %s2022_s21, %s2023_s22, %s2024_s24  }
  0x18   : > { %p1703_p1 = scmp.ge.s32.totalorder %s2020_s20, 1  ;;  %p201_p2 = scmp.lt.s32.totalorder %s2020_s20, 3 }
  0x1a   : > { %p202_p3 = pnand %p1703_p1, %p201_p2 }
  0x1b   : > { %s2127_s26 = sand.u32 (!%p202_p3), 1, %s2004_s16  }
  0x1c   : > { %205 = sbr.rel (%p202_p3) target bundleno = 861 (0x35d), region = 36  ;;  %s1704_s6 = sshll.u32 (!%p202_p3), %s2127_s26, 6 }
  0x1d   : > { %s208_s7 = scalar_lea.sflag (!%p202_p3), [#allocation4], %s2127_s26  ;;  %s211_s8 = scalar_lea.vmem (!%p202_p3), [#allocation3], %s1704_s6 }
  0x21   : > { %1991 = dma.done.wait (%p2100_p8), %s208_s7, 1024  }
  0x22   : > { %1993 = vsyncadd (%p2100_p8), %s208_s7, 4294966272  ;;  %v1818_v0 = vld [vmem:[%s211_s8 + $0xc] sm:$0xf]  ;;  %v1716_v1 = vld [vmem:[%s211_s8 + $0x8] sm:$0xf]  ;;  %vm323_vm0 = vcmask 130048  }
  0x23   : > { %v1718_v2 = vld [vmem:[%s211_s8 + $0x18] sm:$0xf0]  ;;  %v1820_v3 = vld [vmem:[%s211_s8 + $0x14] sm:$0xf0]  ;;  %v1817_v5 = vld [vmem:[%s211_s8 + $0x4] sm:$0xf] }
  0x24   : > { %v1721_v4 = vor.u32 %v1818_v0, %v1718_v2  ;;  %v1708_v6 = vld [vmem:[%s211_s8] sm:$0xf]  ;;  %v1717_v7 = vor.u32 %v1820_v3, %v1716_v1  ;;  %v1710_v8 = vld [vmem:[%s211_s8 + $0x10] sm:$0xf0]  ;;  %v1819_v9 = vld [vmem:[%s211_s8 + $0xc] sm:$0xf0] }
  0x25   : > { %v1709_v10 = vor.u32 %v1819_v9, %v1708_v6  ;;  %v1713_v11 = vor.u32 %v1817_v5, %v1710_v8  ;;  %v1816_v12 = vld [vmem:[%s2648_s1] sm:$0xff]  ;;  %v1822_v13 = vld [vmem:[%s211_s8 + $0x2c] sm:$0xf]  ;;  %v1772_v14 = vld [vmem:[%s211_s8 + $0x28] sm:$0xf]  ;;  %vm653_vm1 = vcmask 64512  }
  0x26   : > { %293 = vxpose.binary.xlu1.c.b16.start.end [1/2] (short) %v1721_v4, %v1717_v7, 128  ;;  %v1774_v15 = vld [vmem:[%s211_s8 + $0x38] sm:$0xf0]  ;;  %v1824_v16 = vld [vmem:[%s211_s8 + $0x34] sm:$0xf0]  ;;  %v1821_v17 = vld [vmem:[%s211_s8 + $0x24] sm:$0xf] }
  0x27   : > { %269 = vxpose.binary.xlu0.c.b16.start.end [1/2] (short) %v1713_v11, %v1709_v10, 128  ;;  %v1764_v18 = vld [vmem:[%s211_s8 + $0x20] sm:$0xf]  ;;  %v1766_v19 = vld [vmem:[%s211_s8 + $0x30] sm:$0xf0]  ;;  %v1823_v20 = vld [vmem:[%s211_s8 + $0x2c] sm:$0xf0]  ;;  %v1773_v21 = vor.u32 %v1824_v16, %v1772_v14  ;;  %v1777_v22 = vor.u32 %v1822_v13, %v1774_v15 }
  0x28   : > { %427 = vmatpush.bf16.msra.mxu0 %v1816_v12  ;;  %1825 = vmatpush.bf16.msra.mxu2 %v1816_v12  ;;  %v1765_v23 = vor.u32 %v1823_v20, %v1764_v18  ;;  %v1769_v24 = vor.u32 %v1821_v17, %v1766_v19  ;;  %s1705_s12 = sshll.u32 %s2127_s26, 3  ;;  %s1812_s13 = sshll.u32 %s2012_s18, 2 }
  0x29   : > { %1132 = vmatpush.bf16.msra.mxu1 %v1816_v12  ;;  %1826 = vmatpush.bf16.msra.mxu3 %v1816_v12  ;;  %s1606_s22 = scalar_lea.hbm %s2651_s4, %s1812_s13  ;;  %s236_s24 = scalar_lea.vmem [#allocation6], %s1705_s12 }
  0x2a   : > { %s1607_s6 = sshll.u32 %s236_s24, 4  ;;  %s1609_s7 = sshll.u32 %s1606_s22, 4  ;;  %s1608_s6 = int_to_ptr.vmem [resolvable:$true] %s1607_s6  ;;  %s1610_s7 = int_to_ptr.hbm [resolvable:$true] %s1609_s7 }
  0x2b   : > { %s1593_s8 = scalar_lea.sflag [#allocation5], %s2127_s26  ;;  %s1952_s25 = sshra.s32 %s1610_s7, 4  ;;  %s1953_s25 = int_to_ptr.hbm [resolvable:$true] %s1952_s25 }
  0x2c   : > { %s1954_s5 = scalar_lea.hbm %s1953_s25, 8  ;;  %s1958_s9 = scalar_lea.hbm %s2651_s4, 16 }
  0x2d   : > { %p1955_p4 = scmp.ne.s32.totalorder %s1953_s25, %s1954_s5  ;;  %p1959_p7 = scmp.lt.s32.totalorder %s1953_s25, %s2651_s4 }
  0x2e   : > { %p1960_p8 = scmp.lt.s32.totalorder %s1958_s9, %s1954_s5 }
  0x2f   : > { %p1956_p5 = pnand %p1955_p4, %p2104_p9 }
  0x30   : > { %p1961_p10 = por %p1960_p8, %p1959_p7 }
  0x31   : > { %p1957_p6 = pneg %p1956_p5 }
  0x33   : > { %p1962_p13 = pnand %p1961_p10, %p1957_p6 }
  0xa6   : > { %1005 = vxpose.binary.xlu1.c.b16.start.end [1/2] (short) %v1777_v22, %v1773_v21, 128 }
  0xa7   : > { %981 = vxpose.binary.xlu0.c.b16.start.end [1/2] (short) %v1769_v24, %v1765_v23, 128 }
  0xd2   : > { %v301_v25 = vpop.trf.xlu1 }
  0xd3   : > { %v277_v26 = vpop.trf.xlu0  ;;  %1742 = vmatmul.msk.bf16.vlgmr.msra.gmra.mxu2 %vm323_vm0, %v301_v25 }
  0xd4   : > { %1726 = vmatmul.msk.bf16.vlgmr.msra.gmra.mxu0 %vm323_vm0, %v277_v26 }
  0xda   : > { %v302_v27 = vpop.trf.xlu1 }
  0xdb   : > { %v278_v28 = vpop.trf.xlu0 }
  0xe2   : > { %v303_v29 = vpop.trf.xlu1 }
  0xe3   : > { %v279_v30 = vpop.trf.xlu0  ;;  %1743 = vmatmul.msk.bf16.gmra.mxu2 %vm323_vm0, %v303_v29 }
  0xe4   : > { %1727 = vmatmul.msk.bf16.gmra.mxu0 %vm323_vm0, %v279_v30 }
  0xea   : > { %v2142_v31 = vpop.trf.xlu1 }
  0xeb   : > { %v2144_v32 = vpop.trf.xlu0 }
  0xf2   : > { %v305_v33 = vpop.trf.xlu1 }
  0xf3   : > { %v281_v34 = vpop.trf.xlu0  ;;  %1744 = vmatmul.msk.bf16.gmra.mxu2 %vm323_vm0, %v305_v33 }
  0xf4   : > { %1728 = vmatmul.msk.bf16.gmra.mxu0 %vm323_vm0, %v281_v34 }
  0xfa   : > { %v2148_v35 = vpop.trf.xlu1 }
  0xfb   : > { %v2150_v36 = vpop.trf.xlu0 }
 0x102   : > { %v307_v37 = vpop.trf.xlu1 }
 0x103   : > { %v283_v38 = vpop.trf.xlu0  ;;  %1745 = vmatmul.msk.bf16.gmra.mxu2 %vm323_vm0, %v307_v37 }
 0x104   : > { %1729 = vmatmul.msk.bf16.gmra.mxu0 %vm323_vm0, %v283_v38 }
 0x10a   : > { %v2154_v39 = vpop.trf.xlu1 }
 0x10b   : > { %v2156_v40 = vpop.trf.xlu0 }
 0x112   : > { %v309_v41 = vpop.trf.xlu1 }
 0x113   : > { %v285_v42 = vpop.trf.xlu0  ;;  %1746 = vmatmul.msk.bf16.gmra.mxu2 %vm323_vm0, %v309_v41 }
 0x114   : > { %1730 = vmatmul.msk.bf16.gmra.mxu0 %vm323_vm0, %v285_v42 }
 0x11a   : > { %v2160_v43 = vpop.trf.xlu1 }
 0x11b   : > { %v2162_v44 = vpop.trf.xlu0 }
 0x122   : > { %v311_v45 = vpop.trf.xlu1 }
 0x123   : > { %v287_v46 = vpop.trf.xlu0  ;;  %1747 = vmatmul.msk.bf16.gmra.mxu2 %vm323_vm0, %v311_v45 }
 0x124   : > { %1731 = vmatmul.msk.bf16.gmra.mxu0 %vm323_vm0, %v287_v46 }
 0x12a   : > { %v2166_v47 = vpop.trf.xlu1 }
 0x12b   : > { %v2168_v48 = vpop.trf.xlu0 }
 0x132   : > { %v313_v49 = vpop.trf.xlu1 }
 0x133   : > { %v289_v50 = vpop.trf.xlu0  ;;  %1748 = vmatmul.msk.bf16.gmra.mxu2 %vm323_vm0, %v313_v49 }
 0x134   : > { %1732 = vmatmul.msk.bf16.gmra.mxu0 %vm323_vm0, %v289_v50 }
 0x13a   : > { %v2172_v51 = vpop.trf.xlu1 }
 0x13b   : > { %v2174_v52 = vpop.trf.xlu0 }
 0x142   : > { %v315_v53 = vpop.trf.xlu1 }
 0x143   : > { %v291_v54 = vpop.trf.xlu0  ;;  %1749 = vmatmul.msk.bf16.gmra.mxu2 %vm323_vm0, %v315_v53 }
 0x144   : > { %1733 = vmatmul.msk.bf16.gmra.mxu0 %vm323_vm0, %v291_v54 }
 0x14a   : > { %v2178_v55 = vpop.trf.xlu1 }
 0x14b   : > { %v2180_v56 = vpop.trf.xlu0 }
 0x151   : > { %v429_v57 = vpop.f32.mrf.mxu0 }
 0x152   : > { %v589_v58 = vmax.f32 %v429_v57, 0.0  ;;  %v1013_v59 = vpop.trf.xlu1 }
 0x153   : > { %v989_v60 = vpop.trf.xlu0  ;;  %1750 = vmatmul.msk.bf16.gmra.mxu2 %vm323_vm0, %v302_v27  ;;  %1794 = vmatmul.msk.bf16.vlgmr.msra.gmra.mxu3 %vm323_vm0, %v1013_v59 }
 0x154   : > { %654 = vst.msk [vmem:[#allocation2] sm:$0xff] %vm653_vm1, %v589_v58  ;;  %1734 = vmatmul.msk.bf16.gmra.mxu0 %vm323_vm0, %v278_v28  ;;  %1778 = vmatmul.msk.bf16.vlgmr.msra.gmra.mxu1 %vm323_vm0, %v989_v60 }
 0x156   : > { %v509_v61 = vpop.f32.mrf.mxu2 }
 0x157   : > { %v621_v62 = vmax.f32 %v509_v61, 0.0 }
 0x159   : > { %686 = vst.msk [vmem:[#allocation2 + $0x100] sm:$0xff] %vm653_vm1, %v621_v62  ;;  %v431_v63 = vpop.f32.mrf.mxu0 }
 0x15a   : > { %v590_v0 = vmax.f32 %v431_v63, 0.0  ;;  %v2188_v1 = vpop.trf.xlu1 }
 0x15b   : > { %v2190_v2 = vpop.trf.xlu0 }
 0x15c   : > { %655 = vst.msk [vmem:[#allocation2 + $0x8] sm:$0xff] %vm653_vm1, %v590_v0 }
 0x15e   : > { %v511_v3 = vpop.f32.mrf.mxu2 }
 0x15f   : > { %v622_v4 = vmax.f32 %v511_v3, 0.0 }
 0x161   : > { %687 = vst.msk [vmem:[#allocation2 + $0x108] sm:$0xff] %vm653_vm1, %v622_v4  ;;  %v434_v5 = vpop.f32.mrf.mxu0 }
 0x162   : > { %v591_v6 = vmax.f32 %v434_v5, 0.0  ;;  %v1015_v7 = vpop.trf.xlu1 }
 0x163   : > { %v991_v8 = vpop.trf.xlu0  ;;  %1751 = vmatmul.msk.bf16.gmra.mxu2 %vm323_vm0, %v2142_v31  ;;  %1795 = vmatmul.msk.bf16.gmra.mxu3 %vm323_vm0, %v1015_v7  ;;  %v718_v9 = vld [vmem:[#allocation2] ss:$2 sm:$0xff]  ;;  %v782_v10 = vld [vmem:[#allocation2 + $0x1] ss:$2 sm:$0xff] }
 0x164   : > { %656 = vst.msk [vmem:[#allocation2 + $0x10] sm:$0xff] %vm653_vm1, %v591_v6  ;;  %1735 = vmatmul.msk.bf16.gmra.mxu0 %vm323_vm0, %v2144_v32  ;;  %1779 = vmatmul.msk.bf16.gmra.mxu1 %vm323_vm0, %v991_v8  ;;  %v2201_v11 = vadd.f32 %v782_v10, %v718_v9 }
 0x166   : > { %v514_v12 = vpop.f32.mrf.mxu2 }
 0x167   : > { %v623_v13 = vmax.f32 %v514_v12, 0.0 }
 0x169   : > { %688 = vst.msk [vmem:[#allocation2 + $0x110] sm:$0xff] %vm653_vm1, %v623_v13  ;;  %v436_v14 = vpop.f32.mrf.mxu0 }
 0x16a   : > { %v592_v15 = vmax.f32 %v436_v14, 0.0  ;;  %v2204_v16 = vpop.trf.xlu1 }
 0x16b   : > { %v2206_v17 = vpop.trf.xlu0 }
 0x16c   : > { %657 = vst.msk [vmem:[#allocation2 + $0x18] sm:$0xff] %vm653_vm1, %v592_v15 }
 0x16e   : > { %v516_v18 = vpop.f32.mrf.mxu2 }
 0x16f   : > { %v624_v19 = vmax.f32 %v516_v18, 0.0 }
 0x171   : > { %689 = vst.msk [vmem:[#allocation2 + $0x118] sm:$0xff] %vm653_vm1, %v624_v19  ;;  %v439_v20 = vpop.f32.mrf.mxu0 }
 0x172   : > { %v593_v21 = vmax.f32 %v439_v20, 0.0  ;;  %v1017_v22 = vpop.trf.xlu1 }
 0x173   : > { %v993_v23 = vpop.trf.xlu0  ;;  %1752 = vmatmul.msk.bf16.gmra.mxu2 %vm323_vm0, %v2148_v35  ;;  %1796 = vmatmul.msk.bf16.gmra.mxu3 %vm323_vm0, %v1017_v22 }
 0x174   : > { %658 = vst.msk [vmem:[#allocation2 + $0x20] sm:$0xff] %vm653_vm1, %v593_v21  ;;  %1736 = vmatmul.msk.bf16.gmra.mxu0 %vm323_vm0, %v2150_v36  ;;  %1780 = vmatmul.msk.bf16.gmra.mxu1 %vm323_vm0, %v993_v23 }
 0x176   : > { %v519_v24 = vpop.f32.mrf.mxu2 }
 0x177   : > { %v625_v25 = vmax.f32 %v519_v24, 0.0 }
 0x179   : > { %690 = vst.msk [vmem:[#allocation2 + $0x120] sm:$0xff] %vm653_vm1, %v625_v25  ;;  %v441_v26 = vpop.f32.mrf.mxu0 }
 0x17a   : > { %v594_v27 = vmax.f32 %v441_v26, 0.0  ;;  %v2218_v28 = vpop.trf.xlu1 }
 0x17b   : > { %v2220_v29 = vpop.trf.xlu0 }
 0x17c   : > { %659 = vst.msk [vmem:[#allocation2 + $0x28] sm:$0xff] %vm653_vm1, %v594_v27 }
 0x17e   : > { %v521_v30 = vpop.f32.mrf.mxu2 }
 0x17f   : > { %v626_v31 = vmax.f32 %v521_v30, 0.0 }
 0x181   : > { %691 = vst.msk [vmem:[#allocation2 + $0x128] sm:$0xff] %vm653_vm1, %v626_v31  ;;  %v444_v32 = vpop.f32.mrf.mxu0 }
 0x182   : > { %v595_v33 = vmax.f32 %v444_v32, 0.0  ;;  %v1019_v34 = vpop.trf.xlu1 }
 0x183   : > { %v995_v35 = vpop.trf.xlu0  ;;  %1753 = vmatmul.msk.bf16.gmra.mxu2 %vm323_vm0, %v2154_v39  ;;  %1797 = vmatmul.msk.bf16.gmra.mxu3 %vm323_vm0, %v1019_v34 }
 0x184   : > { %660 = vst.msk [vmem:[#allocation2 + $0x30] sm:$0xff] %vm653_vm1, %v595_v33  ;;  %1737 = vmatmul.msk.bf16.gmra.mxu0 %vm323_vm0, %v2156_v40  ;;  %1781 = vmatmul.msk.bf16.gmra.mxu1 %vm323_vm0, %v995_v35 }
 0x186   : > { %v524_v36 = vpop.f32.mrf.mxu2 }
 0x187   : > { %v627_v37 = vmax.f32 %v524_v36, 0.0 }
 0x189   : > { %692 = vst.msk [vmem:[#allocation2 + $0x130] sm:$0xff] %vm653_vm1, %v627_v37  ;;  %v446_v38 = vpop.f32.mrf.mxu0 }
 0x18a   : > { %v596_v41 = vmax.f32 %v446_v38, 0.0  ;;  %v2232_v42 = vpop.trf.xlu1 }
 0x18b   : > { %v2234_v45 = vpop.trf.xlu0 }
 0x18c   : > { %661 = vst.msk [vmem:[#allocation2 + $0x38] sm:$0xff] %vm653_vm1, %v596_v41 }
 0x18e   : > { %v526_v39 = vpop.f32.mrf.mxu2 }
 0x18f   : > { %v628_v46 = vmax.f32 %v526_v39, 0.0 }
 0x191   : > { %693 = vst.msk [vmem:[#allocation2 + $0x138] sm:$0xff] %vm653_vm1, %v628_v46  ;;  %v449_v49 = vpop.f32.mrf.mxu0 }
 0x192   : > { %v597_v40 = vmax.f32 %v449_v49, 0.0  ;;  %v1021_v50 = vpop.trf.xlu1 }
 0x193   : > { %v997_v53 = vpop.trf.xlu0  ;;  %1754 = vmatmul.msk.bf16.gmra.mxu2 %vm323_vm0, %v2160_v43  ;;  %1798 = vmatmul.msk.bf16.gmra.mxu3 %vm323_vm0, %v1021_v50 }
 0x194   : > { %662 = vst.msk [vmem:[#allocation2 + $0x40] sm:$0xff] %vm653_vm1, %v597_v40  ;;  %1738 = vmatmul.msk.bf16.gmra.mxu0 %vm323_vm0, %v2162_v44  ;;  %1782 = vmatmul.msk.bf16.gmra.mxu1 %vm323_vm0, %v997_v53 }
 0x196   : > { %v529_v54 = vpop.f32.mrf.mxu2 }
 0x197   : > { %v629_v57 = vmax.f32 %v529_v54, 0.0  ;;  %v2299_v54 = vld [vmem:[#allocation2 + $0x100] ss:$2 sm:$0xff] }
 0x199   : > { %694 = vst.msk [vmem:[#allocation2 + $0x140] sm:$0xff] %vm653_vm1, %v629_v57  ;;  %v451_v58 = vpop.f32.mrf.mxu0  ;;  %v2301_v57 = vld [vmem:[#allocation2 + $0x101] ss:$2 sm:$0xff] }
 0x19a   : > { %v598_v59 = vmax.f32 %v451_v58, 0.0  ;;  %v2246_v60 = vpop.trf.xlu1 }
 0x19b   : > { %v2248_v61 = vpop.trf.xlu0 }
 0x19c   : > { %663 = vst.msk [vmem:[#allocation2 + $0x48] sm:$0xff] %vm653_vm1, %v598_v59 }
 0x19e   : > { %v531_v43 = vpop.f32.mrf.mxu2 }
 0x19f   : > { %v630_v62 = vmax.f32 %v531_v43, 0.0 }
 0x1a1   : > { %695 = vst.msk [vmem:[#allocation2 + $0x148] sm:$0xff] %vm653_vm1, %v630_v62  ;;  %v454_v63 = vpop.f32.mrf.mxu0 }
 0x1a2   : > { %v599_v44 = vmax.f32 %v454_v63, 0.0  ;;  %v1023_v0 = vpop.trf.xlu1 }
 0x1a3   : > { %v999_v3 = vpop.trf.xlu0  ;;  %1755 = vmatmul.msk.bf16.gmra.mxu2 %vm323_vm0, %v2166_v47  ;;  %1799 = vmatmul.msk.bf16.gmra.mxu3 %vm323_vm0, %v1023_v0  ;;  %v726_v4 = vld [vmem:[#allocation2 + $0x40] ss:$2 sm:$0xff]  ;;  %v790_v5 = vld [vmem:[#allocation2 + $0x41] ss:$2 sm:$0xff] }
 0x1a4   : > { %664 = vst.msk [vmem:[#allocation2 + $0x50] sm:$0xff] %vm653_vm1, %v599_v44  ;;  %1739 = vmatmul.msk.bf16.gmra.mxu0 %vm323_vm0, %v2168_v48  ;;  %1783 = vmatmul.msk.bf16.gmra.mxu1 %vm323_vm0, %v999_v3  ;;  %v2259_v6 = vadd.f32 %v790_v5, %v726_v4 }
 0x1a6   : > { %v534_v7 = vpop.f32.mrf.mxu2 }
 0x1a7   : > { %v631_v8 = vmax.f32 %v534_v7, 0.0  ;;  %v2313_v7 = vld [vmem:[#allocation2 + $0x10] ss:$2 sm:$0xff] }
 0x1a9   : > { %696 = vst.msk [vmem:[#allocation2 + $0x150] sm:$0xff] %vm653_vm1, %v631_v8  ;;  %v456_v9 = vpop.f32.mrf.mxu0  ;;  %v2315_v8 = vld [vmem:[#allocation2 + $0x11] ss:$2 sm:$0xff] }
 0x1aa   : > { %v600_v10 = vmax.f32 %v456_v9, 0.0  ;;  %v2262_v47 = vpop.trf.xlu1 }
 0x1ab   : > { %v2264_v12 = vpop.trf.xlu0 }
 0x1ac   : > { %665 = vst.msk [vmem:[#allocation2 + $0x58] sm:$0xff] %vm653_vm1, %v600_v10 }
 0x1ae   : > { %v536_v13 = vpop.f32.mrf.mxu2 }
 0x1af   : > { %v632_v14 = vmax.f32 %v536_v13, 0.0 }
 0x1b1   : > { %697 = vst.msk [vmem:[#allocation2 + $0x158] sm:$0xff] %vm653_vm1, %v632_v14  ;;  %v459_v48 = vpop.f32.mrf.mxu0 }
 0x1b2   : > { %v601_v15 = vmax.f32 %v459_v48, 0.0  ;;  %v1025_v18 = vpop.trf.xlu1 }
 0x1b3   : > { %v1001_v19 = vpop.trf.xlu0  ;;  %1756 = vmatmul.msk.bf16.gmra.mxu2 %vm323_vm0, %v2172_v51  ;;  %1800 = vmatmul.msk.bf16.gmra.mxu3 %vm323_vm0, %v1025_v18  ;;  %v2321_v18 = vld [vmem:[#allocation2 + $0x110] ss:$2 sm:$0xff] }
 0x1b4   : > { %666 = vst.msk [vmem:[#allocation2 + $0x60] sm:$0xff] %vm653_vm1, %v601_v15  ;;  %1740 = vmatmul.msk.bf16.gmra.mxu0 %vm323_vm0, %v2174_v52  ;;  %1784 = vmatmul.msk.bf16.gmra.mxu1 %vm323_vm0, %v1001_v19  ;;  %v2323_v19 = vld [vmem:[#allocation2 + $0x111] ss:$2 sm:$0xff] }
 0x1b6   : > { %v539_v20 = vpop.f32.mrf.mxu2 }
 0x1b7   : > { %v633_v21 = vmax.f32 %v539_v20, 0.0 }
 0x1b9   : > { %698 = vst.msk [vmem:[#allocation2 + $0x160] sm:$0xff] %vm653_vm1, %v633_v21  ;;  %v461_v22 = vpop.f32.mrf.mxu0 }
 0x1ba   : > { %v602_v23 = vmax.f32 %v461_v22, 0.0  ;;  %v2276_v24 = vpop.trf.xlu1 }
 0x1bb   : > { %v2278_v25 = vpop.trf.xlu0 }
 0x1bc   : > { %667 = vst.msk [vmem:[#allocation2 + $0x68] sm:$0xff] %vm653_vm1, %v602_v23 }
 0x1be   : > { %v541_v51 = vpop.f32.mrf.mxu2 }
 0x1bf   : > { %v634_v26 = vmax.f32 %v541_v51, 0.0 }
 0x1c1   : > { %699 = vst.msk [vmem:[#allocation2 + $0x168] sm:$0xff] %vm653_vm1, %v634_v26  ;;  %v464_v27 = vpop.f32.mrf.mxu0 }
 0x1c2   : > { %v603_v52 = vmax.f32 %v464_v27, 0.0  ;;  %v1027_v30 = vpop.trf.xlu1 }
 0x1c3   : > { %v1003_v31 = vpop.trf.xlu0  ;;  %1757 = vmatmul.msk.bf16.gmra.mxu2 %vm323_vm0, %v2178_v55  ;;  %1801 = vmatmul.msk.bf16.gmra.mxu3 %vm323_vm0, %v1027_v30 }
 0x1c4   : > { %668 = vst.msk [vmem:[#allocation2 + $0x70] sm:$0xff] %vm653_vm1, %v603_v52  ;;  %1741 = vmatmul.msk.bf16.gmra.mxu0 %vm323_vm0, %v2180_v56  ;;  %1785 = vmatmul.msk.bf16.gmra.mxu1 %vm323_vm0, %v1003_v31  ;;  %v722_v31 = vld [vmem:[#allocation2 + $0x20] ss:$2 sm:$0xff] }
 0x1c6   : > { %v544_v32 = vpop.f32.mrf.mxu2 }
 0x1c7   : > { %v635_v33 = vmax.f32 %v544_v32, 0.0  ;;  %v786_v32 = vld [vmem:[#allocation2 + $0x21] ss:$2 sm:$0xff] }
 0x1c9   : > { %700 = vst.msk [vmem:[#allocation2 + $0x170] sm:$0xff] %vm653_vm1, %v635_v33  ;;  %v466_v34 = vpop.f32.mrf.mxu0 }
 0x1ca   : > { %v604_v35 = vmax.f32 %v466_v34, 0.0 }
 0x1cc   : > { %669 = vst.msk [vmem:[#allocation2 + $0x78] sm:$0xff] %vm653_vm1, %v604_v35 }
 0x1ce   : > { %v546_v36 = vpop.f32.mrf.mxu2 }
 0x1cf   : > { %v636_v37 = vmax.f32 %v546_v36, 0.0 }
 0x1d1   : > { %701 = vst.msk [vmem:[#allocation2 + $0x178] sm:$0xff] %vm653_vm1, %v636_v37  ;;  %v469_v55 = vpop.f32.mrf.mxu0  ;;  %v1134_v38 = vpop.f32.mrf.mxu1 }
 0x1d2   : > { %v605_v41 = vmax.f32 %v469_v55, 0.0  ;;  %v1294_v39 = vmax.f32 %v1134_v38, 0.0  ;;  %v2337_v38 = vld [vmem:[#allocation2 + $0x120] ss:$2 sm:$0xff] }
 0x1d3   : > { %1802 = vmatmul.msk.bf16.gmra.mxu3 %vm323_vm0, %v2188_v1 }
 0x1d4   : > { %670 = vst.msk [vmem:[#allocation2 + $0x80] sm:$0xff] %vm653_vm1, %v605_v41  ;;  %1786 = vmatmul.msk.bf16.gmra.mxu1 %vm323_vm0, %v2190_v2 }
 0x1d5   : > { %1358 = vst.msk [vmem:[#allocation2] sm:$0xff] %vm653_vm1, %v1294_v39 }
 0x1d6   : > { %v549_v56 = vpop.f32.mrf.mxu2  ;;  %v1214_v46 = vpop.f32.mrf.mxu3 }
 0x1d7   : > { %v637_v49 = vmax.f32 %v549_v56, 0.0  ;;  %v1326_v40 = vmax.f32 %v1214_v46, 0.0 }
 0x1d9   : > { %702 = vst.msk [vmem:[#allocation2 + $0x180] sm:$0xff] %vm653_vm1, %v637_v49  ;;  %v471_v50 = vpop.f32.mrf.mxu0  ;;  %v1136_v53 = vpop.f32.mrf.mxu1 }
 0x1da   : > { %v606_v1 = vmax.f32 %v471_v50, 0.0  ;;  %v1295_v58 = vmax.f32 %v1136_v53, 0.0  ;;  %1390 = vst.msk [vmem:[#allocation2 + $0x100] sm:$0xff] %vm653_vm1, %v1326_v40 }
 0x1dc   : > { %671 = vst.msk [vmem:[#allocation2 + $0x88] sm:$0xff] %vm653_vm1, %v606_v1 }
 0x1dd   : > { %1359 = vst.msk [vmem:[#allocation2 + $0x8] sm:$0xff] %vm653_vm1, %v1295_v58  ;;  %v724_v58 = vld [vmem:[#allocation2 + $0x30] ss:$2 sm:$0xff] }
 0x1de   : > { %v551_v2 = vpop.f32.mrf.mxu2  ;;  %v1216_v59 = vpop.f32.mrf.mxu3 }
 0x1df   : > { %v638_v43 = vmax.f32 %v551_v2, 0.0  ;;  %v1327_v62 = vmax.f32 %v1216_v59, 0.0  ;;  %v788_v2 = vld [vmem:[#allocation2 + $0x31] ss:$2 sm:$0xff] }
 0x1e1   : > { %703 = vst.msk [vmem:[#allocation2 + $0x188] sm:$0xff] %vm653_vm1, %v638_v43  ;;  %v474_v63 = vpop.f32.mrf.mxu0  ;;  %v1139_v44 = vpop.f32.mrf.mxu1 }
 0x1e2   : > { %v607_v0 = vmax.f32 %v474_v63, 0.0  ;;  %v1296_v3 = vmax.f32 %v1139_v44, 0.0  ;;  %1391 = vst.msk [vmem:[#allocation2 + $0x108] sm:$0xff] %vm653_vm1, %v1327_v62 }
 0x1e3   : > { %1803 = vmatmul.msk.bf16.gmra.mxu3 %vm323_vm0, %v2204_v16  ;;  %v734_v4 = vld [vmem:[#allocation2 + $0x80] ss:$2 sm:$0xff]  ;;  %v798_v5 = vld [vmem:[#allocation2 + $0x81] ss:$2 sm:$0xff] }
 0x1e4   : > { %672 = vst.msk [vmem:[#allocation2 + $0x90] sm:$0xff] %vm653_vm1, %v607_v0  ;;  %1787 = vmatmul.msk.bf16.gmra.mxu1 %vm323_vm0, %v2206_v17  ;;  %v2317_v9 = vadd.f32 %v798_v5, %v734_v4 }
 0x1e5   : > { %1360 = vst.msk [vmem:[#allocation2 + $0x10] sm:$0xff] %vm653_vm1, %v1296_v3  ;;  %v2353_v3 = vld [vmem:[#allocation2 + $0x130] ss:$2 sm:$0xff] }
 0x1e6   : > { %v554_v10 = vpop.f32.mrf.mxu2  ;;  %v1219_v13 = vpop.f32.mrf.mxu3 }
 0x1e7   : > { %v639_v14 = vmax.f32 %v554_v10, 0.0  ;;  %v1328_v48 = vmax.f32 %v1219_v13, 0.0  ;;  %v848_v13 = vadd.f32 %v788_v2, %v724_v58  ;;  %v2387_v58 = vld [vmem:[#allocation2 + $0x140] ss:$2 sm:$0xff]  ;;  %v2389_v2 = vld [vmem:[#allocation2 + $0x141] ss:$2 sm:$0xff] }
 0x1e9   : > { %704 = vst.msk [vmem:[#allocation2 + $0x190] sm:$0xff] %vm653_vm1, %v639_v14  ;;  %v476_v16 = vpop.f32.mrf.mxu0  ;;  %v1141_v15 = vpop.f32.mrf.mxu1 }
 0x1ea   : > { %v608_v17 = vmax.f32 %v476_v16, 0.0  ;;  %v1297_v20 = vmax.f32 %v1141_v15, 0.0  ;;  %1392 = vst.msk [vmem:[#allocation2 + $0x110] sm:$0xff] %vm653_vm1, %v1328_v48  ;;  %v847_v16 = vadd.f32 %v786_v32, %v722_v31  ;;  %v1422_v15 = vld [vmem:[#allocation2] ss:$2 sm:$0xff] }
 0x1ec   : > { %673 = vst.msk [vmem:[#allocation2 + $0x98] sm:$0xff] %vm653_vm1, %v608_v17  ;;  %v1454_v17 = vld [vmem:[#allocation2 + $0x1] ss:$2 sm:$0xff] }
 0x1ed   : > { %1361 = vst.msk [vmem:[#allocation2 + $0x18] sm:$0xff] %vm653_vm1, %v1297_v20  ;;  %v1486_v31 = vadd.f32 %v1454_v17, %v1422_v15 }
 0x1ee   : > { %v556_v21 = vpop.f32.mrf.mxu2  ;;  %v1221_v22 = vpop.f32.mrf.mxu3 }
 0x1ef   : > { %v640_v23 = vmax.f32 %v556_v21, 0.0  ;;  %v1329_v51 = vmax.f32 %v1221_v22, 0.0  ;;  %v846_v22 = vadd.f32 %v2315_v8, %v2313_v7 }
 0x1f1   : > { %705 = vst.msk [vmem:[#allocation2 + $0x198] sm:$0xff] %vm653_vm1, %v640_v23  ;;  %v479_v26 = vpop.f32.mrf.mxu0  ;;  %v1144_v27 = vpop.f32.mrf.mxu1 }
 0x1f2   : > { %v609_v52 = vmax.f32 %v479_v26, 0.0  ;;  %v1298_v30 = vmax.f32 %v1144_v27, 0.0  ;;  %1393 = vst.msk [vmem:[#allocation2 + $0x118] sm:$0xff] %vm653_vm1, %v1329_v51  ;;  %v878_v27 = vadd.f32 %v848_v13, %v846_v22  ;;  %v2406_v22 = vld [vmem:[#allocation2 + $0x51] ss:$2 sm:$0xff] }
 0x1f3   : > { %1804 = vmatmul.msk.bf16.gmra.mxu3 %vm323_vm0, %v2218_v28  ;;  %v2339_v28 = vld [vmem:[#allocation2 + $0x121] ss:$2 sm:$0xff] }
 0x1f4   : > { %674 = vst.msk [vmem:[#allocation2 + $0xa0] sm:$0xff] %vm653_vm1, %v609_v52  ;;  %1788 = vmatmul.msk.bf16.gmra.mxu1 %vm323_vm0, %v2220_v29  ;;  %v2366_v52 = vld [vmem:[%s2649_s2] ss:$0 sm:$0xff] }
 0x1f5   : > { %1362 = vst.msk [vmem:[#allocation2 + $0x20] sm:$0xff] %vm653_vm1, %v1298_v30  ;;  %v1423_v30 = vld [vmem:[#allocation2 + $0x10] ss:$2 sm:$0xff] }
 0x1f6   : > { %v559_v33 = vpop.f32.mrf.mxu2  ;;  %v1224_v34 = vpop.f32.mrf.mxu3 }
 0x1f7   : > { %v641_v35 = vmax.f32 %v559_v33, 0.0  ;;  %v1330_v36 = vmax.f32 %v1224_v34, 0.0  ;;  %v877_v34 = vadd.f32 %v847_v16, %v2201_v11 }
 0x1f9   : > { %706 = vst.msk [vmem:[#allocation2 + $0x1a0] sm:$0xff] %vm653_vm1, %v641_v35  ;;  %v481_v37 = vpop.f32.mrf.mxu0  ;;  %v1146_v55 = vpop.f32.mrf.mxu1  ;;  %v1455_v35 = vld [vmem:[#allocation2 + $0x11] ss:$2 sm:$0xff] }
 0x1fa   : > { %v610_v41 = vmax.f32 %v481_v37, 0.0  ;;  %v1299_v39 = vmax.f32 %v1146_v55, 0.0  ;;  %1394 = vst.msk [vmem:[#allocation2 + $0x120] sm:$0xff] %vm653_vm1, %v1330_v36  ;;  %v897_v37 = vmul.f32 %v2366_v52, %v878_v27  ;;  %v1487_v55 = vadd.f32 %v1455_v35, %v1423_v30 }
 0x1fc   : > { %675 = vst.msk [vmem:[#allocation2 + $0xa8] sm:$0xff] %vm653_vm1, %v610_v41 }
 0x1fd   : > { %1363 = vst.msk [vmem:[#allocation2 + $0x28] sm:$0xff] %vm653_vm1, %v1299_v39 }
 0x1fe   : > { %v561_v29 = vpop.f32.mrf.mxu2  ;;  %v1226_v56 = vpop.f32.mrf.mxu3 }
 0x1ff   : > { %v642_v46 = vmax.f32 %v561_v29, 0.0  ;;  %v1331_v49 = vmax.f32 %v1226_v56, 0.0  ;;  %v896_v29 = vmul.f32 %v2366_v52, %v877_v34 }
 0x201   : > { %707 = vst.msk [vmem:[#allocation2 + $0x1a8] sm:$0xff] %vm653_vm1, %v642_v46  ;;  %v484_v40 = vpop.f32.mrf.mxu0  ;;  %v1149_v50 = vpop.f32.mrf.mxu1  ;;  %v2381_v46 = vld [vmem:[%s2650_s3] ss:$0 sm:$0xff] }
 0x202   : > { %v611_v53 = vmax.f32 %v484_v40, 0.0  ;;  %v1300_v1 = vmax.f32 %v1149_v50, 0.0  ;;  %1395 = vst.msk [vmem:[#allocation2 + $0x128] sm:$0xff] %vm653_vm1, %v1331_v49 }
 0x203   : > { %1805 = vmatmul.msk.bf16.gmra.mxu3 %vm323_vm0, %v2232_v42  ;;  %v2355_v42 = vld [vmem:[#allocation2 + $0x131] ss:$2 sm:$0xff] }
 0x204   : > { %676 = vst.msk [vmem:[#allocation2 + $0xb0] sm:$0xff] %vm653_vm1, %v611_v53  ;;  %1789 = vmatmul.msk.bf16.gmra.mxu1 %vm323_vm0, %v2234_v45  ;;  %v1424_v45 = vld [vmem:[#allocation2 + $0x20] ss:$2 sm:$0xff]  ;;  %v1456_v10 = vld [vmem:[#allocation2 + $0x21] ss:$2 sm:$0xff]  ;;  %v916_v53 = vadd.f32 %v2381_v46, %v897_v37 }
 0x205   : > { %1364 = vst.msk [vmem:[#allocation2 + $0x30] sm:$0xff] %vm653_vm1, %v1300_v1  ;;  %v1488_v23 = vadd.f32 %v1456_v10, %v1424_v45 }
 0x206   : > { %v564_v59 = vpop.f32.mrf.mxu2  ;;  %v1229_v43 = vpop.f32.mrf.mxu3 }
 0x207   : > { %v643_v62 = vmax.f32 %v564_v59, 0.0  ;;  %v1332_v63 = vmax.f32 %v1229_v43, 0.0  ;;  %v1518_v7 = vadd.f32 %v1488_v23, %v1486_v31 }
 0x209   : > { %708 = vst.msk [vmem:[#allocation2 + $0x1b0] sm:$0xff] %vm653_vm1, %v643_v62  ;;  %v486_v44 = vpop.f32.mrf.mxu0  ;;  %v1151_v0 = vpop.f32.mrf.mxu1  ;;  %v1534_v49 = vmul.f32 %v2366_v52, %v1518_v7  ;;  %v915_v62 = vadd.f32 %v2381_v46, %v896_v29  ;;  %v794_v29 = vld [vmem:[#allocation2 + $0x61] ss:$2 sm:$0xff] }
 0x20a   : > { %v612_v4 = vmax.f32 %v486_v44, 0.0  ;;  %v1301_v5 = vmax.f32 %v1151_v0, 0.0  ;;  %1396 = vst.msk [vmem:[#allocation2 + $0x130] sm:$0xff] %vm653_vm1, %v1332_v63 }
 0x20b   : > { %v1550_v63 = vadd.f32 %v2381_v46, %v1534_v49  ;;  %v931_v0 = vpack.c.bf16 %v916_v53, %v915_v62  ;;  %v2428_v53 = vld [vmem:[#allocation2 + $0x160] ss:$2 sm:$0xff] }
 0x20c   : > { %677 = vst.msk [vmem:[#allocation2 + $0xb8] sm:$0xff] %vm653_vm1, %v612_v4 }
 0x20d   : > { %1365 = vst.msk [vmem:[#allocation2 + $0x38] sm:$0xff] %vm653_vm1, %v1301_v5 }
 0x20e   : > { %v566_v14 = vpop.f32.mrf.mxu2  ;;  %v1231_v48 = vpop.f32.mrf.mxu3 }
 0x20f   : > { %v644_v20 = vmax.f32 %v566_v14, 0.0  ;;  %v1333_v21 = vmax.f32 %v1231_v48, 0.0 }
 0x211   : > { %709 = vst.msk [vmem:[#allocation2 + $0x1b8] sm:$0xff] %vm653_vm1, %v644_v20  ;;  %v489_v51 = vpop.f32.mrf.mxu0  ;;  %v1154_v26 = vpop.f32.mrf.mxu1 }
 0x212   : > { %v613_v32 = vmax.f32 %v489_v51, 0.0  ;;  %v1302_v33 = vmax.f32 %v1154_v26, 0.0  ;;  %1397 = vst.msk [vmem:[#allocation2 + $0x138] sm:$0xff] %vm653_vm1, %v1333_v21  ;;  %v2404_v21 = vld [vmem:[#allocation2 + $0x50] ss:$2 sm:$0xff] }
 0x213   : > { %1806 = vmatmul.msk.bf16.gmra.mxu3 %vm323_vm0, %v2246_v60 }
 0x214   : > { %678 = vst.msk [vmem:[#allocation2 + $0xc0] sm:$0xff] %vm653_vm1, %v613_v32  ;;  %1790 = vmatmul.msk.bf16.gmra.mxu1 %vm323_vm0, %v2248_v61  ;;  %v1425_v8 = vld [vmem:[#allocation2 + $0x30] ss:$2 sm:$0xff]  ;;  %v1457_v36 = vld [vmem:[#allocation2 + $0x31] ss:$2 sm:$0xff] }
 0x215   : > { %v1489_v41 = vadd.f32 %v1457_v36, %v1425_v8  ;;  %1366 = vst.msk [vmem:[#allocation2 + $0x40] sm:$0xff] %vm653_vm1, %v1302_v33  ;;  %v2412_v32 = vld [vmem:[#allocation2 + $0x150] ss:$2 sm:$0xff]  ;;  %v2414_v33 = vld [vmem:[#allocation2 + $0x151] ss:$2 sm:$0xff] }
 0x216   : > { %v569_v11 = vpop.f32.mrf.mxu2  ;;  %v1234_v39 = vpop.f32.mrf.mxu3 }
 0x217   : > { %v645_v56 = vmax.f32 %v569_v11, 0.0  ;;  %v1334_v60 = vmax.f32 %v1234_v39, 0.0  ;;  %v1519_v61 = vadd.f32 %v1489_v41, %v1487_v55  ;;  %v730_v39 = vld [vmem:[#allocation2 + $0x60] ss:$2 sm:$0xff] }
 0x219   : > { %710 = vst.msk [vmem:[#allocation2 + $0x1c0] sm:$0xff] %vm653_vm1, %v645_v56  ;;  %v491_v40 = vpop.f32.mrf.mxu0  ;;  %v1156_v50 = vpop.f32.mrf.mxu1  ;;  %v1535_v1 = vmul.f32 %v2366_v52, %v1519_v61 }
 0x21a   : > { %v614_v59 = vmax.f32 %v491_v40, 0.0  ;;  %v1303_v43 = vmax.f32 %v1156_v50, 0.0  ;;  %1398 = vst.msk [vmem:[#allocation2 + $0x140] sm:$0xff] %vm653_vm1, %v1334_v60 }
 0x21b   : > { %v1551_v44 = vadd.f32 %v2381_v46, %v1535_v1 }
 0x21c   : > { %679 = vst.msk [vmem:[#allocation2 + $0xc8] sm:$0xff] %vm653_vm1, %v614_v59 }
 0x21d   : > { %v1566_v4 = vpack.c.bf16 %v1551_v44, %v1550_v63  ;;  %1367 = vst.msk [vmem:[#allocation2 + $0x48] sm:$0xff] %vm653_vm1, %v1303_v43  ;;  %v1028_v44 = vpop.trf.xlu1 }
 0x21e   : > { %v571_v5 = vpop.f32.mrf.mxu2  ;;  %v1236_v45 = vpop.f32.mrf.mxu3 }
 0x21f   : > { %1896 = vxpose.binary.xlu2.c.b16.start [1/16] (narrow) %v1566_v4, %v931_v0, 16  ;;  %v646_v10 = vmax.f32 %v571_v5, 0.0  ;;  %v1335_v13 = vmax.f32 %v1236_v45, 0.0  ;;  %v1004_v0 = vpop.trf.xlu0 }
 0x221   : > { %711 = vst.msk [vmem:[#allocation2 + $0x1c8] sm:$0xff] %vm653_vm1, %v646_v10  ;;  %v494_v14 = vpop.f32.mrf.mxu0  ;;  %v1159_v48 = vpop.f32.mrf.mxu1 }
 0x222   : > { %v615_v16 = vmax.f32 %v494_v14, 0.0  ;;  %v1304_v15 = vmax.f32 %v1159_v48, 0.0  ;;  %1399 = vst.msk [vmem:[#allocation2 + $0x148] sm:$0xff] %vm653_vm1, %v1335_v13  ;;  %v732_v13 = vld [vmem:[#allocation2 + $0x70] ss:$2 sm:$0xff] }
 0x223   : > { %1807 = vmatmul.msk.bf16.gmra.mxu3 %vm323_vm0, %v2262_v47  ;;  %v742_v17 = vld [vmem:[#allocation2 + $0xc0] ss:$2 sm:$0xff]  ;;  %v806_v20 = vld [vmem:[#allocation2 + $0xc1] ss:$2 sm:$0xff]  ;;  %v796_v14 = vld [vmem:[#allocation2 + $0x71] ss:$2 sm:$0xff] }
 0x224   : > { %680 = vst.msk [vmem:[#allocation2 + $0xd0] sm:$0xff] %vm653_vm1, %v615_v16  ;;  %1791 = vmatmul.msk.bf16.gmra.mxu1 %vm323_vm0, %v2264_v12  ;;  %v2408_v23 = vadd.f32 %v806_v20, %v742_v17 }
 0x225   : > { %1368 = vst.msk [vmem:[#allocation2 + $0x50] sm:$0xff] %vm653_vm1, %v1304_v15 }
 0x226   : > { %v574_v51 = vpop.f32.mrf.mxu2  ;;  %v1239_v26 = vpop.f32.mrf.mxu3 }
 0x227   : > { %v647_v27 = vmax.f32 %v574_v51, 0.0  ;;  %v1336_v30 = vmax.f32 %v1239_v26, 0.0  ;;  %v2442_v26 = vld [vmem:[#allocation2 + $0x170] ss:$2 sm:$0xff] }
 0x229   : > { %712 = vst.msk [vmem:[#allocation2 + $0x1d0] sm:$0xff] %vm653_vm1, %v647_v27  ;;  %v496_v47 = vpop.f32.mrf.mxu0  ;;  %v1161_v31 = vpop.f32.mrf.mxu1  ;;  %v2444_v27 = vld [vmem:[#allocation2 + $0x171] ss:$2 sm:$0xff] }
 0x22a   : > { %v616_v12 = vmax.f32 %v496_v47, 0.0  ;;  %v1305_v34 = vmax.f32 %v1161_v31, 0.0  ;;  %1400 = vst.msk [vmem:[#allocation2 + $0x150] sm:$0xff] %vm653_vm1, %v1336_v30 }
 0x22c   : > { %681 = vst.msk [vmem:[#allocation2 + $0xd8] sm:$0xff] %vm653_vm1, %v616_v12 }
 0x22d   : > { %1369 = vst.msk [vmem:[#allocation2 + $0x58] sm:$0xff] %vm653_vm1, %v1305_v34  ;;  %v852_v34 = vadd.f32 %v796_v14, %v732_v13 }
 0x22e   : > { %v576_v35 = vpop.f32.mrf.mxu2  ;;  %v1241_v7 = vpop.f32.mrf.mxu3 }
 0x22f   : > { %v648_v8 = vmax.f32 %v576_v35, 0.0  ;;  %v1337_v36 = vmax.f32 %v1241_v7, 0.0 }
 0x231   : > { %713 = vst.msk [vmem:[#allocation2 + $0x1d8] sm:$0xff] %vm653_vm1, %v648_v8  ;;  %v499_v37 = vpop.f32.mrf.mxu0  ;;  %v1164_v55 = vpop.f32.mrf.mxu1  ;;  %v850_v8 = vadd.f32 %v2406_v22, %v2404_v21 }
 0x232   : > { %v617_v41 = vmax.f32 %v499_v37, 0.0  ;;  %v1306_v11 = vmax.f32 %v1164_v55, 0.0  ;;  %1401 = vst.msk [vmem:[#allocation2 + $0x158] sm:$0xff] %vm653_vm1, %v1337_v36  ;;  %v1426_v36 = vld [vmem:[#allocation2 + $0x40] ss:$2 sm:$0xff] }
 0x233   : > { %1808 = vmatmul.msk.bf16.gmra.mxu3 %vm323_vm0, %v2276_v24  ;;  %v2430_v24 = vld [vmem:[#allocation2 + $0x161] ss:$2 sm:$0xff] }
 0x234   : > { %682 = vst.msk [vmem:[#allocation2 + $0xe0] sm:$0xff] %vm653_vm1, %v617_v41  ;;  %1792 = vmatmul.msk.bf16.gmra.mxu1 %vm323_vm0, %v2278_v25  ;;  %v1458_v37 = vld [vmem:[#allocation2 + $0x41] ss:$2 sm:$0xff] }
 0x235   : > { %1370 = vst.msk [vmem:[#allocation2 + $0x60] sm:$0xff] %vm653_vm1, %v1306_v11  ;;  %v851_v11 = vadd.f32 %v794_v29, %v730_v39 }
 0x236   : > { %v579_v56 = vpop.f32.mrf.mxu2  ;;  %v1244_v60 = vpop.f32.mrf.mxu3 }
 0x237   : > { %v649_v61 = vmax.f32 %v579_v56, 0.0  ;;  %v1338_v49 = vmax.f32 %v1244_v60, 0.0 }
 0x239   : > { %714 = vst.msk [vmem:[#allocation2 + $0x1e0] sm:$0xff] %vm653_vm1, %v649_v61  ;;  %v501_v40 = vpop.f32.mrf.mxu0  ;;  %v1166_v50 = vpop.f32.mrf.mxu1  ;;  %v880_v61 = vadd.f32 %v852_v34, %v850_v8  ;;  %v800_v34 = vld [vmem:[#allocation2 + $0x91] ss:$2 sm:$0xff]  ;;  %v2471_v8 = vld [vmem:[#allocation2 + $0x190] ss:$2 sm:$0xff] }
 0x23a   : > { %v618_v1 = vmax.f32 %v501_v40, 0.0  ;;  %v1307_v59 = vmax.f32 %v1166_v50, 0.0  ;;  %1402 = vst.msk [vmem:[#allocation2 + $0x160] sm:$0xff] %vm653_vm1, %v1338_v49  ;;  %v1490_v49 = vadd.f32 %v1458_v37, %v1426_v36  ;;  %v1427_v50 = vld [vmem:[#allocation2 + $0x50] ss:$2 sm:$0xff] }
 0x23b   : > { %v899_v39 = vmul.f32 %v2366_v52, %v880_v61  ;;  %v2473_v36 = vld [vmem:[#allocation2 + $0x191] ss:$2 sm:$0xff]  ;;  %v738_v61 = vld [vmem:[#allocation2 + $0xa0] ss:$2 sm:$0xff] }
 0x23c   : > { %683 = vst.msk [vmem:[#allocation2 + $0xe8] sm:$0xff] %vm653_vm1, %v618_v1  ;;  %v1459_v1 = vld [vmem:[#allocation2 + $0x51] ss:$2 sm:$0xff] }
 0x23d   : > { %1371 = vst.msk [vmem:[#allocation2 + $0x68] sm:$0xff] %vm653_vm1, %v1307_v59  ;;  %v879_v59 = vadd.f32 %v851_v11, %v2259_v6  ;;  %v1491_v29 = vadd.f32 %v1459_v1, %v1427_v50  ;;  %v2479_v1 = vld [vmem:[#allocation2 + $0x1a0] ss:$2 sm:$0xff] }
 0x23e   : > { %v581_v25 = vpop.f32.mrf.mxu2  ;;  %v1246_v43 = vpop.f32.mrf.mxu3 }
 0x23f   : > { %v650_v62 = vmax.f32 %v581_v25, 0.0  ;;  %v1339_v63 = vmax.f32 %v1246_v43, 0.0 }
 0x241   : > { %715 = vst.msk [vmem:[#allocation2 + $0x1e8] sm:$0xff] %vm653_vm1, %v650_v62  ;;  %v504_v4 = vpop.f32.mrf.mxu0  ;;  %v1169_v5 = vpop.f32.mrf.mxu1 }
 0x242   : > { %v619_v45 = vmax.f32 %v504_v4, 0.0  ;;  %v1308_v10 = vmax.f32 %v1169_v5, 0.0  ;;  %1403 = vst.msk [vmem:[#allocation2 + $0x168] sm:$0xff] %vm653_vm1, %v1339_v63  ;;  %v2458_v5 = vld [vmem:[#allocation2 + $0x180] ss:$2 sm:$0xff] }
 0x243   : > { %1809 = vmatmul.msk.bf16.gmra.mxu3 %vm323_vm0, %v1028_v44  ;;  %v898_v44 = vmul.f32 %v2366_v52, %v879_v59  ;;  %v2481_v59 = vld [vmem:[#allocation2 + $0x1a1] ss:$2 sm:$0xff] }
 0x244   : > { %684 = vst.msk [vmem:[#allocation2 + $0xf0] sm:$0xff] %vm653_vm1, %v619_v45  ;;  %1793 = vmatmul.msk.bf16.gmra.mxu1 %vm323_vm0, %v1004_v0  ;;  %v1428_v31 = vld [vmem:[#allocation2 + $0x60] ss:$2 sm:$0xff]  ;;  %v1460_v12 = vld [vmem:[#allocation2 + $0x61] ss:$2 sm:$0xff] }
 0x245   : > { %1372 = vst.msk [vmem:[#allocation2 + $0x70] sm:$0xff] %vm653_vm1, %v1308_v10  ;;  %v1492_v56 = vadd.f32 %v1460_v12, %v1428_v31  ;;  %v2460_v45 = vld [vmem:[#allocation2 + $0x181] ss:$2 sm:$0xff]  ;;  %v918_v10 = vadd.f32 %v2381_v46, %v899_v39  ;;  %v736_v12 = vld [vmem:[#allocation2 + $0x90] ss:$2 sm:$0xff] }
 0x246   : > { %v584_v48 = vpop.f32.mrf.mxu2  ;;  %v1249_v16 = vpop.f32.mrf.mxu3 }
 0x247   : > { %v651_v15 = vmax.f32 %v584_v48, 0.0  ;;  %v1340_v17 = vmax.f32 %v1249_v16, 0.0  ;;  %v1520_v25 = vadd.f32 %v1492_v56, %v1490_v49  ;;  %v917_v48 = vadd.f32 %v2381_v46, %v898_v44  ;;  %v802_v49 = vld [vmem:[#allocation2 + $0xa1] ss:$2 sm:$0xff] }
 0x249   : > { %716 = vst.msk [vmem:[#allocation2 + $0x1f0] sm:$0xff] %vm653_vm1, %v651_v15  ;;  %v506_v20 = vpop.f32.mrf.mxu0  ;;  %v1171_v51 = vpop.f32.mrf.mxu1  ;;  %v1536_v4 = vmul.f32 %v2366_v52, %v1520_v25 }
 0x24a   : > { %v620_v30 = vmax.f32 %v506_v20, 0.0  ;;  %v1309_v47 = vmax.f32 %v1171_v51, 0.0  ;;  %1404 = vst.msk [vmem:[#allocation2 + $0x170] sm:$0xff] %vm653_vm1, %v1340_v17  ;;  %v932_v17 = vpack.c.bf16 %v918_v10, %v917_v48 }
 0x24b   : > { %v1552_v16 = vadd.f32 %v2381_v46, %v1536_v4  ;;  %v2487_v4 = vld [vmem:[#allocation2 + $0x1b0] ss:$2 sm:$0xff] }
 0x24c   : > { %685 = vst.msk [vmem:[#allocation2 + $0xf8] sm:$0xff] %vm653_vm1, %v620_v30 }
 0x24d   : > { %1373 = vst.msk [vmem:[#allocation2 + $0x78] sm:$0xff] %vm653_vm1, %v1309_v47 }
 0x24e   : > { %v586_v35 = vpop.f32.mrf.mxu2  ;;  %v1251_v7 = vpop.f32.mrf.mxu3 }
 0x24f   : > { %v652_v55 = vmax.f32 %v586_v35, 0.0  ;;  %v1341_v41 = vmax.f32 %v1251_v7, 0.0 }
 0x251   : > { %717 = vst.msk [vmem:[#allocation2 + $0x1f8] sm:$0xff] %vm653_vm1, %v652_v55  ;;  %v1174_v60 = vpop.f32.mrf.mxu1 }
 0x252   : > { %v1310_v40 = vmax.f32 %v1174_v60, 0.0  ;;  %1405 = vst.msk [vmem:[#allocation2 + $0x178] sm:$0xff] %vm653_vm1, %v1341_v41 }
 0x254   : > { %v1429_v21 = vld [vmem:[#allocation2 + $0x70] ss:$2 sm:$0xff]  ;;  %v1461_v22 = vld [vmem:[#allocation2 + $0x71] ss:$2 sm:$0xff]  ;;  %1374 = vst.msk [vmem:[#allocation2 + $0x80] sm:$0xff] %vm653_vm1, %v1310_v40 }
 0x255   : > { %v1493_v43 = vadd.f32 %v1461_v22, %v1429_v21 }
 0x256   : > { %v1254_v62 = vpop.f32.mrf.mxu3 }
 0x257   : > { %v1342_v63 = vmax.f32 %v1254_v62, 0.0  ;;  %v1521_v0 = vadd.f32 %v1493_v43, %v1491_v29  ;;  %v740_v62 = vld [vmem:[#allocation2 + $0xb0] ss:$2 sm:$0xff] }
 0x259   : > { %v1176_v6 = vpop.f32.mrf.mxu1  ;;  %v1537_v13 = vmul.f32 %v2366_v52, %v1521_v0  ;;  %1406 = vst.msk [vmem:[#allocation2 + $0x180] sm:$0xff] %vm653_vm1, %v1342_v63  ;;  %v804_v63 = vld [vmem:[#allocation2 + $0xb1] ss:$2 sm:$0xff] }
 0x25a   : > { %v1311_v14 = vmax.f32 %v1176_v6, 0.0  ;;  %v2489_v6 = vld [vmem:[#allocation2 + $0x1b1] ss:$2 sm:$0xff] }
 0x25b   : > { %v1553_v15 = vadd.f32 %v2381_v46, %v1537_v13 }
 0x25c   : > { %1375 = vst.msk [vmem:[#allocation2 + $0x88] sm:$0xff] %vm653_vm1, %v1311_v14 }
 0x25d   : > { %v1567_v20 = vpack.c.bf16 %v1553_v15, %v1552_v16  ;;  %v856_v16 = vadd.f32 %v804_v63, %v740_v62  ;;  %v2503_v62 = vld [vmem:[#allocation2 + $0x1c1] ss:$2 sm:$0xff] }
 0x25e   : > { %v1256_v51 = vpop.f32.mrf.mxu3 }
 0x25f   : > { %1897 = vxpose.binary.xlu2.c.b16.cont [2/16] (narrow) %v1567_v20, %v932_v17, 16  ;;  %v1343_v30 = vmax.f32 %v1256_v51, 0.0  ;;  %v854_v51 = vadd.f32 %v800_v34, %v736_v12 }
 0x261   : > { %v1179_v47 = vpop.f32.mrf.mxu1  ;;  %1407 = vst.msk [vmem:[#allocation2 + $0x188] sm:$0xff] %vm653_vm1, %v1343_v30  ;;  %v855_v30 = vadd.f32 %v802_v49, %v738_v61 }
 0x262   : > { %v1312_v31 = vmax.f32 %v1179_v47, 0.0 }
 0x263   : > { %v1430_v15 = vld [vmem:[#allocation2 + $0x80] ss:$2 sm:$0xff]  ;;  %v1462_v17 = vld [vmem:[#allocation2 + $0x81] ss:$2 sm:$0xff] }
 0x264   : > { %1376 = vst.msk [vmem:[#allocation2 + $0x90] sm:$0xff] %vm653_vm1, %v1312_v31 }
 0x266   : > { %v1259_v35 = vpop.f32.mrf.mxu3 }
 0x267   : > { %v1344_v7 = vmax.f32 %v1259_v35, 0.0  ;;  %v882_v35 = vadd.f32 %v856_v16, %v854_v51  ;;  %v744_v51 = vld [vmem:[#allocation2 + $0xd0] ss:$2 sm:$0xff] }
 0x269   : > { %v1181_v37 = vpop.f32.mrf.mxu1  ;;  %1408 = vst.msk [vmem:[#allocation2 + $0x190] sm:$0xff] %vm653_vm1, %v1344_v7  ;;  %v1494_v7 = vadd.f32 %v1462_v17, %v1430_v15 }
 0x26a   : > { %v1313_v55 = vmax.f32 %v1181_v37, 0.0 }
 0x26c   : > { %1377 = vst.msk [vmem:[#allocation2 + $0x98] sm:$0xff] %vm653_vm1, %v1313_v55 }
 0x26e   : > { %v1261_v41 = vpop.f32.mrf.mxu3 }
 0x26f   : > { %v1345_v11 = vmax.f32 %v1261_v41, 0.0 }
 0x271   : > { %v1184_v56 = vpop.f32.mrf.mxu1  ;;  %1409 = vst.msk [vmem:[#allocation2 + $0x198] sm:$0xff] %vm653_vm1, %v1345_v11 }
 0x272   : > { %v1314_v60 = vmax.f32 %v1184_v56, 0.0  ;;  %v881_v56 = vadd.f32 %v855_v30, %v2317_v9  ;;  %v808_v30 = vld [vmem:[#allocation2 + $0xd1] ss:$2 sm:$0xff] }
 0x273   : > { %v1431_v55 = vld [vmem:[#allocation2 + $0x90] ss:$2 sm:$0xff]  ;;  %v1463_v41 = vld [vmem:[#allocation2 + $0x91] ss:$2 sm:$0xff] }
 0x274   : > { %1378 = vst.msk [vmem:[#allocation2 + $0xa0] sm:$0xff] %vm653_vm1, %v1314_v60  ;;  %v900_v61 = vmul.f32 %v2366_v52, %v881_v56 }
 0x276   : > { %v1264_v40 = vpop.f32.mrf.mxu3 }
 0x277   : > { %v1346_v50 = vmax.f32 %v1264_v40, 0.0 }
 0x279   : > { %v1186_v25 = vpop.f32.mrf.mxu1  ;;  %1410 = vst.msk [vmem:[#allocation2 + $0x1a0] sm:$0xff] %vm653_vm1, %v1346_v50 }
 0x27a   : > { %v1315_v21 = vmax.f32 %v1186_v25, 0.0  ;;  %v901_v25 = vmul.f32 %v2366_v52, %v882_v35  ;;  %v2512_v35 = vld [vmem:[#allocation2 + $0x1d0] ss:$2 sm:$0xff] }
 0x27c   : > { %1379 = vst.msk [vmem:[#allocation2 + $0xa8] sm:$0xff] %vm653_vm1, %v1315_v21  ;;  %v1495_v21 = vadd.f32 %v1463_v41, %v1431_v55 }
 0x27e   : > { %v1266_v22 = vpop.f32.mrf.mxu3 }
 0x27f   : > { %v1347_v39 = vmax.f32 %v1266_v22, 0.0 }
 0x281   : > { %v1189_v29 = vpop.f32.mrf.mxu1  ;;  %1411 = vst.msk [vmem:[#allocation2 + $0x1a8] sm:$0xff] %vm653_vm1, %v1347_v39 }
 0x282   : > { %v1316_v43 = vmax.f32 %v1189_v29, 0.0  ;;  %v920_v29 = vadd.f32 %v2381_v46, %v901_v25 }
 0x283   : > { %v1432_v14 = vld [vmem:[#allocation2 + $0xa0] ss:$2 sm:$0xff]  ;;  %v1464_v48 = vld [vmem:[#allocation2 + $0xa1] ss:$2 sm:$0xff] }
 0x284   : > { %1380 = vst.msk [vmem:[#allocation2 + $0xb0] sm:$0xff] %vm653_vm1, %v1316_v43  ;;  %v1496_v47 = vadd.f32 %v1464_v48, %v1432_v14  ;;  %v2501_v43 = vld [vmem:[#allocation2 + $0x1c0] ss:$2 sm:$0xff] }
 0x286   : > { %v1269_v44 = vpop.f32.mrf.mxu3  ;;  %v1522_v60 = vadd.f32 %v1496_v47, %v1494_v7  ;;  %v2514_v7 = vld [vmem:[#allocation2 + $0x1d1] ss:$2 sm:$0xff] }
 0x287   : > { %v1348_v0 = vmax.f32 %v1269_v44, 0.0 }
 0x288   : > { %v1538_v22 = vmul.f32 %v2366_v52, %v1522_v60 }
 0x289   : > { %v1191_v10 = vpop.f32.mrf.mxu1  ;;  %1412 = vst.msk [vmem:[#allocation2 + $0x1b0] sm:$0xff] %vm653_vm1, %v1348_v0  ;;  %v919_v0 = vadd.f32 %v2381_v46, %v900_v61 }
 0x28a   : > { %v1317_v13 = vmax.f32 %v1191_v10, 0.0  ;;  %v1554_v10 = vadd.f32 %v2381_v46, %v1538_v22 }
 0x28b   : > { %v933_v14 = vpack.c.bf16 %v920_v29, %v919_v0 }
 0x28c   : > { %1381 = vst.msk [vmem:[#allocation2 + $0xb8] sm:$0xff] %vm653_vm1, %v1317_v13 }
 0x28e   : > { %v1271_v20 = vpop.f32.mrf.mxu3 }
 0x28f   : > { %v1349_v31 = vmax.f32 %v1271_v20, 0.0 }
 0x291   : > { %v1194_v37 = vpop.f32.mrf.mxu1  ;;  %1413 = vst.msk [vmem:[#allocation2 + $0x1b8] sm:$0xff] %vm653_vm1, %v1349_v31 }
 0x292   : > { %v1318_v11 = vmax.f32 %v1194_v37, 0.0 }
 0x293   : > { %v1433_v40 = vld [vmem:[#allocation2 + $0xb0] ss:$2 sm:$0xff]  ;;  %v1465_v50 = vld [vmem:[#allocation2 + $0xb1] ss:$2 sm:$0xff] }
 0x294   : > { %v1497_v12 = vadd.f32 %v1465_v50, %v1433_v40  ;;  %1382 = vst.msk [vmem:[#allocation2 + $0xc0] sm:$0xff] %vm653_vm1, %v1318_v11  ;;  %v746_v40 = vld [vmem:[#allocation2 + $0xe0] ss:$2 sm:$0xff]  ;;  %v810_v50 = vld [vmem:[#allocation2 + $0xe1] ss:$2 sm:$0xff] }
 0x296   : > { %v1274_v34 = vpop.f32.mrf.mxu3  ;;  %v1523_v49 = vadd.f32 %v1497_v12, %v1495_v21  ;;  %v2520_v12 = vld [vmem:[#allocation2 + $0x1e0] ss:$2 sm:$0xff] }
 0x297   : > { %v1350_v39 = vmax.f32 %v1274_v34, 0.0  ;;  %v2522_v34 = vld [vmem:[#allocation2 + $0x1e1] ss:$2 sm:$0xff] }
 0x298   : > { %v1539_v9 = vmul.f32 %v2366_v52, %v1523_v49 }
 0x299   : > { %v1196_v63 = vpop.f32.mrf.mxu1  ;;  %1414 = vst.msk [vmem:[#allocation2 + $0x1c0] sm:$0xff] %vm653_vm1, %v1350_v39 }
 0x29a   : > { %v1319_v44 = vmax.f32 %v1196_v63, 0.0  ;;  %v1555_v13 = vadd.f32 %v2381_v46, %v1539_v9  ;;  %v748_v63 = vld [vmem:[#allocation2 + $0xf0] ss:$2 sm:$0xff] }
 0x29c   : > { %v1568_v48 = vpack.c.bf16 %v1555_v13, %v1554_v10  ;;  %1383 = vst.msk [vmem:[#allocation2 + $0xc8] sm:$0xff] %vm653_vm1, %v1319_v44  ;;  %v812_v44 = vld [vmem:[#allocation2 + $0xf1] ss:$2 sm:$0xff]  ;;  %v2528_v13 = vld [vmem:[#allocation2 + $0x1f0] ss:$2 sm:$0xff] }
 0x29e   : > { %1898 = vxpose.binary.xlu2.c.b16.cont [3/16] (narrow) %v1568_v48, %v933_v14, 16  ;;  %v1276_v16 = vpop.f32.mrf.mxu3  ;;  %v2530_v14 = vld [vmem:[#allocation2 + $0x1f1] ss:$2 sm:$0xff] }
 0x29f   : > { %v1351_v15 = vmax.f32 %v1276_v16, 0.0 }
 0x2a1   : > { %v1199_v17 = vpop.f32.mrf.mxu1  ;;  %1415 = vst.msk [vmem:[#allocation2 + $0x1c8] sm:$0xff] %vm653_vm1, %v1351_v15 }
 0x2a2   : > { %v1320_v20 = vmax.f32 %v1199_v17, 0.0 }
 0x2a4   : > { %1384 = vst.msk [vmem:[#allocation2 + $0xd0] sm:$0xff] %vm653_vm1, %v1320_v20  ;;  %v860_v20 = vadd.f32 %v812_v44, %v748_v63 }
 0x2a6   : > { %v1279_v47 = vpop.f32.mrf.mxu3 }
 0x2a7   : > { %v1352_v31 = vmax.f32 %v1279_v47, 0.0  ;;  %v1434_v47 = vld [vmem:[#allocation2 + $0xc0] ss:$2 sm:$0xff] }
 0x2a9   : > { %v1201_v37 = vpop.f32.mrf.mxu1  ;;  %1416 = vst.msk [vmem:[#allocation2 + $0x1d0] sm:$0xff] %vm653_vm1, %v1352_v31  ;;  %v1466_v31 = vld [vmem:[#allocation2 + $0xc1] ss:$2 sm:$0xff] }
 0x2aa   : > { %v1321_v55 = vmax.f32 %v1201_v37, 0.0 }
 0x2ac   : > { %1385 = vst.msk [vmem:[#allocation2 + $0xd8] sm:$0xff] %vm653_vm1, %v1321_v55  ;;  %v858_v55 = vadd.f32 %v808_v30, %v744_v51 }
 0x2ae   : > { %v1281_v41 = vpop.f32.mrf.mxu3 }
 0x2af   : > { %v1353_v11 = vmax.f32 %v1281_v41, 0.0  ;;  %v859_v41 = vadd.f32 %v810_v50, %v746_v40  ;;  %v1438_v50 = vld [vmem:[#allocation2 + $0x100] ss:$2 sm:$0xff] }
 0x2b1   : > { %v1204_v56 = vpop.f32.mrf.mxu1  ;;  %1417 = vst.msk [vmem:[#allocation2 + $0x1d8] sm:$0xff] %vm653_vm1, %v1353_v11 }
 0x2b2   : > { %v1322_v60 = vmax.f32 %v1204_v56, 0.0 }
 0x2b4   : > { %1386 = vst.msk [vmem:[#allocation2 + $0xe0] sm:$0xff] %vm653_vm1, %v1322_v60  ;;  %v884_v60 = vadd.f32 %v860_v20, %v858_v55  ;;  %v1472_v20 = vld [vmem:[#allocation2 + $0x121] ss:$2 sm:$0xff]  ;;  %v863_v55 = vadd.f32 %v2339_v28, %v2337_v38 }
 0x2b6   : > { %v1284_v25 = vpop.f32.mrf.mxu3 }
 0x2b7   : > { %v1354_v21 = vmax.f32 %v1284_v25, 0.0  ;;  %v1498_v25 = vadd.f32 %v1466_v31, %v1434_v47  ;;  %v1473_v47 = vld [vmem:[#allocation2 + $0x131] ss:$2 sm:$0xff]  ;;  %v861_v31 = vadd.f32 %v2301_v57, %v2299_v54 }
 0x2b9   : > { %v1206_v61 = vpop.f32.mrf.mxu1  ;;  %1418 = vst.msk [vmem:[#allocation2 + $0x1e0] sm:$0xff] %vm653_vm1, %v1354_v21  ;;  %v1435_v21 = vld [vmem:[#allocation2 + $0xd0] ss:$2 sm:$0xff] }
 0x2ba   : > { %v1323_v49 = vmax.f32 %v1206_v61, 0.0  ;;  %v1467_v61 = vld [vmem:[#allocation2 + $0xd1] ss:$2 sm:$0xff] }
 0x2bb   : > { %v1499_v63 = vadd.f32 %v1467_v61, %v1435_v21 }
 0x2bc   : > { %1387 = vst.msk [vmem:[#allocation2 + $0xe8] sm:$0xff] %vm653_vm1, %v1323_v49  ;;  %v883_v49 = vadd.f32 %v859_v41, %v2408_v23 }
 0x2be   : > { %v1286_v22 = vpop.f32.mrf.mxu3  ;;  %v902_v51 = vmul.f32 %v2366_v52, %v883_v49 }
 0x2bf   : > { %v1355_v39 = vmax.f32 %v1286_v22, 0.0 }
 0x2c0   : > { %v921_v41 = vadd.f32 %v2381_v46, %v902_v51  ;;  %v1442_v51 = vld [vmem:[#allocation2 + $0x140] ss:$2 sm:$0xff] }
 0x2c1   : > { %v1209_v29 = vpop.f32.mrf.mxu1  ;;  %1419 = vst.msk [vmem:[#allocation2 + $0x1e8] sm:$0xff] %vm653_vm1, %v1355_v39 }
 0x2c2   : > { %v1324_v9 = vmax.f32 %v1209_v29, 0.0 }
 0x2c3   : > { %v1436_v15 = vld [vmem:[#allocation2 + $0xe0] ss:$2 sm:$0xff]  ;;  %v1468_v17 = vld [vmem:[#allocation2 + $0xe1] ss:$2 sm:$0xff] }
 0x2c4   : > { %1388 = vst.msk [vmem:[#allocation2 + $0xf0] sm:$0xff] %vm653_vm1, %v1324_v9  ;;  %v1500_v11 = vadd.f32 %v1468_v17, %v1436_v15  ;;  %v903_v9 = vmul.f32 %v2366_v52, %v884_v60  ;;  %v1441_v17 = vld [vmem:[#allocation2 + $0x130] ss:$2 sm:$0xff]  ;;  %v864_v60 = vadd.f32 %v2355_v42, %v2353_v3 }
 0x2c5   : > { %v1505_v49 = vadd.f32 %v1473_v47, %v1441_v17  ;;  %v867_v47 = vadd.f32 %v2430_v24, %v2428_v53 }
 0x2c6   : > { %v1289_v0 = vpop.f32.mrf.mxu3  ;;  %v1524_v22 = vadd.f32 %v1500_v11, %v1498_v25  ;;  %v922_v15 = vadd.f32 %v2381_v46, %v903_v9 }
 0x2c7   : > { %v1356_v10 = vmax.f32 %v1289_v0, 0.0  ;;  %v1439_v0 = vld [vmem:[#allocation2 + $0x110] ss:$2 sm:$0xff] }
 0x2c8   : > { %v1540_v40 = vmul.f32 %v2366_v52, %v1524_v22  ;;  %v934_v54 = vpack.c.bf16 %v922_v15, %v921_v41 }
 0x2c9   : > { %v1211_v48 = vpop.f32.mrf.mxu1  ;;  %1420 = vst.msk [vmem:[#allocation2 + $0x1f0] sm:$0xff] %vm653_vm1, %v1356_v10  ;;  %v1440_v10 = vld [vmem:[#allocation2 + $0x120] ss:$2 sm:$0xff] }
 0x2ca   : > { %v1325_v16 = vmax.f32 %v1211_v48, 0.0  ;;  %v1470_v48 = vld [vmem:[#allocation2 + $0x101] ss:$2 sm:$0xff]  ;;  %v1556_v11 = vadd.f32 %v2381_v46, %v1540_v40  ;;  %v1504_v61 = vadd.f32 %v1472_v20, %v1440_v10  ;;  %v1444_v40 = vld [vmem:[#allocation2 + $0x160] ss:$2 sm:$0xff]  ;;  %v866_v20 = vadd.f32 %v2414_v33, %v2412_v32 }
 0x2cb   : > { %v1502_v25 = vadd.f32 %v1470_v48, %v1438_v50  ;;  %v1474_v50 = vld [vmem:[#allocation2 + $0x141] ss:$2 sm:$0xff]  ;;  %v1445_v10 = vld [vmem:[#allocation2 + $0x170] ss:$2 sm:$0xff] }
 0x2cc   : > { %1389 = vst.msk [vmem:[#allocation2 + $0xf8] sm:$0xff] %vm653_vm1, %v1325_v16  ;;  %v1471_v16 = vld [vmem:[#allocation2 + $0x111] ss:$2 sm:$0xff]  ;;  %v1476_v48 = vld [vmem:[#allocation2 + $0x161] ss:$2 sm:$0xff] }
 0x2cd   : > { %v1503_v21 = vadd.f32 %v1471_v16, %v1439_v0  ;;  %v1526_v22 = vadd.f32 %v1504_v61, %v1502_v25  ;;  %v1475_v0 = vld [vmem:[#allocation2 + $0x151] ss:$2 sm:$0xff]  ;;  %v1508_v41 = vadd.f32 %v1476_v48, %v1444_v40  ;;  %v1449_v61 = vld [vmem:[#allocation2 + $0x1b0] ss:$2 sm:$0xff] }
 0x2ce   : > { %v1291_v37 = vpop.f32.mrf.mxu3  ;;  %v1477_v16 = vld [vmem:[#allocation2 + $0x171] ss:$2 sm:$0xff] }
 0x2cf   : > { %v1357_v56 = vmax.f32 %v1291_v37, 0.0  ;;  %v862_v37 = vadd.f32 %v2323_v19, %v2321_v18  ;;  %v885_v18 = vadd.f32 %v863_v55, %v861_v31  ;;  %v1527_v38 = vadd.f32 %v1505_v49, %v1503_v21  ;;  %v1481_v49 = vld [vmem:[#allocation2 + $0x1b1] ss:$2 sm:$0xff] }
 0x2d0   : > { %v868_v31 = vadd.f32 %v2444_v27, %v2442_v26 }
 0x2d1   : > { %1421 = vst.msk [vmem:[#allocation2 + $0x1f8] sm:$0xff] %vm653_vm1, %v1357_v56  ;;  %v886_v19 = vadd.f32 %v864_v60, %v862_v37  ;;  %v904_v28 = vmul.f32 %v2366_v52, %v885_v18  ;;  %v1543_v9 = vmul.f32 %v2366_v52, %v1527_v38  ;;  %v1506_v37 = vadd.f32 %v1474_v50, %v1442_v51  ;;  %v1479_v18 = vld [vmem:[#allocation2 + $0x191] ss:$2 sm:$0xff] }
 0x2d2   : > { %v888_v60 = vadd.f32 %v868_v31, %v866_v20  ;;  %v869_v51 = vadd.f32 %v2460_v45, %v2458_v5  ;;  %v1484_v20 = vld [vmem:[#allocation2 + $0x1e1] ss:$2 sm:$0xff] }
 0x2d3   : > { %v1437_v39 = vld [vmem:[#allocation2 + $0xf0] ss:$2 sm:$0xff]  ;;  %v1469_v29 = vld [vmem:[#allocation2 + $0xf1] ss:$2 sm:$0xff]  ;;  %v923_v3 = vadd.f32 %v2381_v46, %v904_v28  ;;  %v1528_v25 = vadd.f32 %v1508_v41, %v1506_v37  ;;  %v872_v28 = vadd.f32 %v2489_v6, %v2487_v4  ;;  %v876_v37 = vadd.f32 %v2530_v14, %v2528_v13 }
 0x2d4   : > { %v1501_v44 = vadd.f32 %v1469_v29, %v1437_v39  ;;  %v905_v39 = vmul.f32 %v2366_v52, %v886_v19  ;;  %v1542_v29 = vmul.f32 %v2366_v52, %v1526_v22  ;;  %v1480_v19 = vld [vmem:[#allocation2 + $0x1a1] ss:$2 sm:$0xff]  ;;  %v874_v41 = vadd.f32 %v2514_v7, %v2512_v35 }
 0x2d5   : > { %v1544_v32 = vmul.f32 %v2366_v52, %v1528_v25 }
 0x2d6   : > { %v1525_v30 = vadd.f32 %v1501_v44, %v1499_v63  ;;  %v924_v42 = vadd.f32 %v2381_v46, %v905_v39  ;;  %v1558_v63 = vadd.f32 %v2381_v46, %v1542_v29  ;;  %v1559_v44 = vadd.f32 %v2381_v46, %v1543_v9  ;;  %v1446_v9 = vld [vmem:[#allocation2 + $0x180] ss:$2 sm:$0xff] }
 0x2d7   : > { %v1560_v26 = vadd.f32 %v2381_v46, %v1544_v32  ;;  %v1513_v39 = vadd.f32 %v1481_v49, %v1449_v61  ;;  %v870_v29 = vadd.f32 %v2473_v36, %v2471_v8 }
 0x2d8   : > { %v1541_v23 = vmul.f32 %v2366_v52, %v1525_v30  ;;  %v1443_v30 = vld [vmem:[#allocation2 + $0x150] ss:$2 sm:$0xff]  ;;  %v935_v15 = vpack.c.bf16 %v924_v42, %v923_v3  ;;  %v1570_v17 = vpack.c.bf16 %v1559_v44, %v1558_v63  ;;  %v1478_v3 = vld [vmem:[#allocation2 + $0x181] ss:$2 sm:$0xff]  ;;  %v871_v42 = vadd.f32 %v2481_v59, %v2479_v1 }
 0x2d9   : > { %v1507_v55 = vadd.f32 %v1475_v0, %v1443_v30  ;;  %v890_v30 = vadd.f32 %v872_v28, %v870_v29  ;;  %v1510_v40 = vadd.f32 %v1478_v3, %v1446_v9  ;;  %v1453_v48 = vld [vmem:[#allocation2 + $0x1f0] ss:$2 sm:$0xff] }
 0x2da   : > { %v1557_v56 = vadd.f32 %v2381_v46, %v1541_v23  ;;  %v865_v23 = vadd.f32 %v2389_v2, %v2387_v58  ;;  %v907_v2 = vmul.f32 %v2366_v52, %v888_v60  ;;  %v889_v0 = vadd.f32 %v871_v42, %v869_v51 }
 0x2db   : > { %v909_v6 = vmul.f32 %v2366_v52, %v890_v30  ;;  %v875_v60 = vadd.f32 %v2522_v34, %v2520_v12 }
 0x2dc   : > { %v1569_v57 = vpack.c.bf16 %v1557_v56, %v1556_v11  ;;  %v1509_v11 = vadd.f32 %v1477_v16, %v1445_v10  ;;  %v887_v56 = vadd.f32 %v867_v47, %v865_v23  ;;  %v926_v24 = vadd.f32 %v2381_v46, %v907_v2  ;;  %v1485_v16 = vld [vmem:[#allocation2 + $0x1f1] ss:$2 sm:$0xff]  ;;  %v1452_v23 = vld [vmem:[#allocation2 + $0x1e0] ss:$2 sm:$0xff] }
 0x2dd   : > { %v908_v36 = vmul.f32 %v2366_v52, %v889_v0  ;;  %v928_v1 = vadd.f32 %v2381_v46, %v909_v6  ;;  %v892_v2 = vadd.f32 %v876_v37, %v874_v41 }
 0x2de   : > { %1899 = vxpose.binary.xlu2.c.b16.cont [4/16] (narrow) %v1569_v57, %v934_v54, 16  ;;  %v1529_v21 = vadd.f32 %v1509_v11, %v1507_v55  ;;  %v906_v58 = vmul.f32 %v2366_v52, %v887_v56  ;;  %v1447_v54 = vld [vmem:[#allocation2 + $0x190] ss:$2 sm:$0xff]  ;;  %v1448_v57 = vld [vmem:[#allocation2 + $0x1a0] ss:$2 sm:$0xff]  ;;  %v1517_v55 = vadd.f32 %v1485_v16, %v1453_v48 }
 0x2df   : > { %v1511_v63 = vadd.f32 %v1479_v18, %v1447_v54  ;;  %v1512_v44 = vadd.f32 %v1480_v19, %v1448_v57  ;;  %v927_v5 = vadd.f32 %v2381_v46, %v908_v36  ;;  %v1450_v11 = vld [vmem:[#allocation2 + $0x1c0] ss:$2 sm:$0xff]  ;;  %v1482_v56 = vld [vmem:[#allocation2 + $0x1c1] ss:$2 sm:$0xff]  ;;  %v911_v35 = vmul.f32 %v2366_v52, %v892_v2 }
 0x2e0   : > { %v1545_v33 = vmul.f32 %v2366_v52, %v1529_v21  ;;  %v925_v53 = vadd.f32 %v2381_v46, %v906_v58  ;;  %v1516_v21 = vadd.f32 %v1484_v20, %v1452_v23  ;;  %v873_v58 = vadd.f32 %v2503_v62, %v2501_v43 }
 0x2e1   : > { %v1531_v50 = vadd.f32 %v1513_v39, %v1511_v63  ;;  %v1530_v4 = vadd.f32 %v1512_v44, %v1510_v40  ;;  %v937_v47 = vpack.c.bf16 %v928_v1, %v927_v5  ;;  %v1514_v32 = vadd.f32 %v1482_v56, %v1450_v11 }
 0x2e2   : > { %v1561_v27 = vadd.f32 %v2381_v46, %v1545_v33  ;;  %v936_v22 = vpack.c.bf16 %v926_v24, %v925_v53  ;;  %v891_v14 = vadd.f32 %v875_v60, %v873_v58  ;;  %v930_v34 = vadd.f32 %v2381_v46, %v911_v35 }
 0x2e3   : > { %v1547_v8 = vmul.f32 %v2366_v52, %v1531_v50  ;;  %v1546_v10 = vmul.f32 %v2366_v52, %v1530_v4  ;;  %v1532_v33 = vadd.f32 %v1516_v21, %v1514_v32 }
 0x2e4   : > { %v1571_v38 = vpack.c.bf16 %v1561_v27, %v1560_v26  ;;  %v910_v53 = vmul.f32 %v2366_v52, %v891_v14 }
 0x2e5   : > { %v1563_v59 = vadd.f32 %v2381_v46, %v1547_v8  ;;  %v1562_v45 = vadd.f32 %v2381_v46, %v1546_v10  ;;  %v1548_v12 = vmul.f32 %v2366_v52, %v1532_v33 }
 0x2e6   : > { %v929_v43 = vadd.f32 %v2381_v46, %v910_v53 }
 0x2e7   : > { %v1572_v31 = vpack.c.bf16 %v1563_v59, %v1562_v45  ;;  %v1564_v62 = vadd.f32 %v2381_v46, %v1548_v12 }
 0x2e8   : > { %v938_v26 = vpack.c.bf16 %v930_v34, %v929_v43 }
 0x2ee   : > { %1900 = vxpose.binary.xlu2.c.b16.cont [5/16] (narrow) %v1570_v17, %v935_v15, 16  ;;  %v1451_v15 = vld [vmem:[#allocation2 + $0x1d0] ss:$2 sm:$0xff]  ;;  %v1483_v17 = vld [vmem:[#allocation2 + $0x1d1] ss:$2 sm:$0xff] }
 0x2ef   : > { %v1515_v25 = vadd.f32 %v1483_v17, %v1451_v15 }
 0x2f1   : > { %v1533_v13 = vadd.f32 %v1517_v55, %v1515_v25 }
 0x2f3   : > { %v1549_v7 = vmul.f32 %v2366_v52, %v1533_v13 }
 0x2f5   : > { %v1565_v24 = vadd.f32 %v2381_v46, %v1549_v7 }
 0x2f7   : > { %v1573_v27 = vpack.c.bf16 %v1565_v24, %v1564_v62 }
 0x2fe   : > { %1901 = vxpose.binary.xlu2.c.b16.cont [6/16] (narrow) %v1571_v38, %v936_v22, 16 }
 0x30e   : > { %1902 = vxpose.binary.xlu2.c.b16.cont [7/16] (narrow) %v1572_v31, %v937_v47, 16 }
 0x31e   : > { %1903 = vxpose.binary.xlu2.c.b16.end [8/16] (narrow) %v1573_v27, %v938_v26, 16 }
 0x34f   : > { %v1904_v61 = vpop.trf.xlu2 }
 0x350   : > { %955 = vst [vmem:[%s236_s24] sm:$0xf] %v1904_v61 }
 0x357   : > { %v1905_v52 = vpop.trf.xlu2 }
 0x358   : > { %1810 = vst [vmem:[%s236_s24 + $0x4] sm:$0xf] %v1905_v52 }
 0x359   : > { %1965 = shalt.err (!%p1962_p13)
}
 0x35a   : > { %s2025_s26 = smov 64   ;;  %s2026_s12 = smov 128  }
 0x35b   : > { %s2027_s13 = smov 4  }
 0x35c   : > { %1829 = dma.vmem_to_hbm [thread:$0]  (%p2104_p9), %s1608_s6, 128, %s1610_s7, %s1593_s8, %s2025_s26, %s2026_s12, %s2027_s13  }
 0x35d PF: > { %s1624_s14 = sand.u32 1, %s2000_s15   ;;  %p1836_p0 = pnand %p1699_p12, %p2111_p11 }
 0x35e   : > { %s1625_s21 = scalar_lea.sflag [#allocation5], %s1624_s14 }
 0x35f   : > { %p1837_p1 = pneg %p1836_p0 }
 0x361   : > { %1995 = dma.done.wait (%p1837_p1), %s1625_s21, 128  }
 0x362   : > { %1997 = vsyncadd (%p1837_p1), %s1625_s21, 4294967168  ;;  %s20_s20 = sadd.s32 1, %s2020_s20   ;;  %s2656_s15 = smov %s2004_s16 }
 0x363   : > { %p17_p2 = scmp.ge.s32.totalorder %s20_s20, 4   ;;  %s2657_s16 = smov %s2008_s17 }
 0x364   : > { %s2658_s17 = smov %s2109_s29  ;;  %s2659_s18 = smov %s2016_s19 }
 0x365   : > { %s2660_s19 = smov %s2662_s23  ;;  %19 = sbr.rel (!%p17_p2) target bundleno = 6 (0x6), region = 146 }
 0x36a   :  { %1631 = vsyncpa [#allocation4], 1 }
 0x36b   :  { %1633 = vsyncpa [#allocation4 + $0x1], 1 }
 0x36c   :  { %1634 = vsyncpa [#allocation5], 1 }
 0x36d   :  { %1636 = vsyncpa [#allocation5 + $0x1], 1 }

</bundles_post_ra>
